<compile_context>
chip_gen: v6e
topology: v6e:2x2x1
jax: 0.10.0
libtpu: 0.0.40
codegen_flags: <defaults>
</compile_context>

<pallas_src>
import jax
import jax.numpy as jnp
from jax import lax
from jax.experimental import pallas as pl
from jax.experimental.pallas import tpu as pltpu

# ---- model / problem sizes (small, consistent with the module) -------------
CONTROL_DIM = 8
STATE_DIM = 8
OUTPUT_DIM = 4
RECURRENT_DIM = 32
NUM_LAYERS = 2          # kernel hard-codes 2 recurrent LSTM layers
BATCH = 4
SEQ = 8


# -----------------------------------------------------------------------------
# Pallas kernel
# -----------------------------------------------------------------------------
def _fused_step(xpc_rows, hc, cc, M, H):
    """One skewed step: layer-0 at time t and layer-1 at time t-1 together.

    hc = [h0 | h1], cc = [c0 | c1]  (B, 2H).  Gate columns are ordered
    [i0 i1 f0 f1 o0 o1 | g0 g1] so sigmoid/tanh and the cell update run on
    contiguous lane blocks covering both layers at once.
    """
    gc = xpc_rows + jnp.dot(hc, M, preferred_element_type=jnp.float32)  # (B, 8H)
    sg = jax.nn.sigmoid(gc[:, :6 * H])
    g_cat = jnp.tanh(gc[:, 6 * H:])
    i_cat = sg[:, 0:2 * H]
    f_cat = sg[:, 2 * H:4 * H]
    o_cat = sg[:, 4 * H:6 * H]
    cc_new = f_cat * cc + i_cat * g_cat
    hc_new = o_cat * jnp.tanh(cc_new)
    return hc_new, cc_new


def switching_lstm_kernel(
    # inputs
    control_ref, h0_ref, c0_ref,
    Wu_ref, bg_ref, M_ref,
    wA_ref, bA_ref, wB_ref, bB_ref,
    P_ref, E_ref, RT_ref, TinvT_ref, CwT_ref, w0_ref,
    # outputs
    outputs_ref, states_ref, AB_ref, hN_ref, cN_ref,
    # scratch
    seq_ref,
):
    N, Cdim = control_ref.shape          # N = T*B
    L, B, H = h0_ref.shape
    Tt = N // B
    S = TinvT_ref.shape[0]

    u_flat = control_ref[...]                                   # (N, C)
    M = M_ref[...]                                               # (2H, 8H)

    # hoisted input projection + biases for BOTH layers (layer-1 cols = bias)
    xpc = (jnp.dot(u_flat, Wu_ref[...], preferred_element_type=jnp.float32)
           + bg_ref[...])                                        # (N, 8H)

    # concatenated carries: hc = [h0 | h1], cc = [c0 | c1]
    hc = jnp.concatenate([h0_ref[0], h0_ref[1]], axis=1)         # (B, 2H)
    cc = jnp.concatenate([c0_ref[0], c0_ref[1]], axis=1)

    # ---- skewed, fully unrolled recurrence (Tt + 1 fused steps) -----------
    # step 0: layer-0 time 0 only; layer-1 half is discarded.
    hc_n, cc_n = _fused_step(xpc[0:B], hc, cc, M, H)
    hc = jnp.concatenate([hc_n[:, :H], hc[:, H:]], axis=1)
    cc = jnp.concatenate([cc_n[:, :H], cc[:, H:]], axis=1)

    # steps 1..Tt-1: layer-0 time t fused with layer-1 time t-1.
    for t in range(1, Tt):
        hc, cc = _fused_step(xpc[t * B:(t + 1) * B], hc, cc, M, H)
        seq_ref[pl.ds((t - 1) * B, B), :] = hc[:, H:]            # layer-1 h at t-1

    hN_ref[0] = hc[:, :H]                                        # h0 at Tt-1
    cN_ref[0] = cc[:, :H]

    # step Tt: layer-1 time Tt-1 only (layer-0 half discarded; layer-1 xpc
    # columns are constant bias, so any row block is valid).
    hc_n, cc_n = _fused_step(xpc[(Tt - 1) * B:Tt * B], hc, cc, M, H)
    seq_ref[pl.ds((Tt - 1) * B, B), :] = hc_n[:, H:]
    hN_ref[1] = hc_n[:, H:]
    cN_ref[1] = cc_n[:, H:]

    x_flat = seq_ref[...]                                        # (N, H)

    # -------- gen_A / gen_B / A construction: batched MXU matmuls ---------
    d = jnp.tanh(jnp.dot(x_flat, wA_ref[...], preferred_element_type=jnp.float32)
                 + bA_ref[...])                                  # (N, S)
    Bm = (jnp.dot(x_flat, wB_ref[...], preferred_element_type=jnp.float32)
          + bB_ref[...])                                         # (N, S*C)
    # A_n = Tinv @ diag(d_n) @ T  ==  reshape(d_n @ P, (S, S))
    A_nm = jnp.dot(d, P_ref[...], preferred_element_type=jnp.float32)   # (N, S*S)
    # single unmasked 128-lane store for [A | B]
    AB_ref[...] = jnp.concatenate([A_nm, Bm], axis=1)

    # hoisted  T @ (B_t u_t)  for every timestep (replication via MXU, not tile)
    u_rep = jnp.dot(u_flat, E_ref[...], preferred_element_type=jnp.float32)   # (N, S*C)
    TBu = jnp.dot(Bm * u_rep, RT_ref[...], preferred_element_type=jnp.float32)  # (N, S)

    # -------- switching recursion in the T-basis: pure VPU FMAs ------------
    # w_t = d_t * w_{t-1} + T (B_t u_t);   s_t = Tinv w_t  recovered in batch.
    w = w0_ref[...]                                              # (B, S)
    rows = []
    for t in range(Tt):
        w = d[t * B:(t + 1) * B] * w + TBu[t * B:(t + 1) * B]
        rows.append(w)
    W = jnp.concatenate(rows, axis=0)                            # (N, S)

    st = jnp.dot(W, TinvT_ref[...], preferred_element_type=jnp.float32)   # (N, S)
    states_ref[...] = st
    outputs_ref[...] = jnp.dot(st, CwT_ref[...],
                               preferred_element_type=jnp.float32)        # (N, O)


# -----------------------------------------------------------------------------
# Parameter init (deterministic, shapes from StableSwitchingLSTM.__init__)
# -----------------------------------------------------------------------------
def init_params(key):
    H, C, S, O = RECURRENT_DIM, CONTROL_DIM, STATE_DIM, OUTPUT_DIM
    ks = jax.random.split(key, 16)
    kH = float(1.0 / (H ** 0.5))
    kS = float(1.0 / (S ** 0.5))

    def u(k, shape, scale):
        return jax.random.uniform(k, shape, jnp.float32, -scale, scale)

    return dict(
        # LSTM layer 0 (input_size = control_dim)
        wih0=u(ks[0], (4 * H, C), kH), whh0=u(ks[1], (4 * H, H), kH),
        bih0=u(ks[2], (4 * H,), kH), bhh0=u(ks[3], (4 * H,), kH),
        # LSTM layer 1 (input_size = recurrent_dim)
        wih1=u(ks[4], (4 * H, H), kH), whh1=u(ks[5], (4 * H, H), kH),
        bih1=u(ks[6], (4 * H,), kH), bhh1=u(ks[7], (4 * H,), kH),
        # T parameter (state_dim x state_dim), nudge diagonal for conditioning
        T=jax.random.normal(ks[8], (S, S), jnp.float32) + 0.5 * jnp.eye(S, dtype=jnp.float32),
        # gen_A: Linear(recurrent_dim -> state_dim)
        wA=u(ks[9], (S, H), kH), bA=u(ks[10], (S,), kH),
        # gen_B: Linear(recurrent_dim -> state_dim * control_dim)
        wB=u(ks[11], (S * C, H), kH), bB=u(ks[12], (S * C,), kH),
        # C: Linear(state_dim -> output_dim, bias=False)
        Cw=u(ks[13], (O, S), kS),
    )


# -----------------------------------------------------------------------------
# Wrapper (glue: transposes / inverse / derived constant matrices / packing)
# -----------------------------------------------------------------------------
def stable_switching_lstm_forward(params, control, previous_output,
                                  previous_state=None, hx=None):
    B, Tt, C = control.shape
    H, S, O, L = RECURRENT_DIM, STATE_DIM, OUTPUT_DIM, NUM_LAYERS

    if hx is None:
        h0 = jnp.zeros((L, B, H), jnp.float32)
        c0 = jnp.zeros((L, B, H), jnp.float32)
    else:
        h0, c0 = hx

    if previous_state is None:
        state0 = jnp.zeros((B, S), jnp.float32).at[:, :O].set(previous_output)
    else:
        state0 = previous_state

    Tmat = params["T"]
    # torch.linalg.inv(self.T) -- no Pallas equivalent, done in glue JAX
    Tinv = jnp.linalg.inv(Tmat)
    # P[k, i*S + j] = Tinv[i, k] * T[k, j]  =>  A_n = reshape(d_n @ P, (S, S))
    P = (Tinv.T[:, :, None] * Tmat[:, None, :]).reshape(S, S * S)
    # replication matrix: (u @ E)[n, s*C + c] = u[n, c]
    E = jnp.tile(jnp.eye(C, dtype=jnp.float32), (1, S))
    # TBu = (Bm * u_rep) @ RT  with RT[s*C + c, i] = T[i, s]  (folds seg-sum + T)
    RT = jnp.repeat(Tmat.T, C, axis=0)

    # ---- pack the two LSTM layers into one skewed block matrix -------------
    def gate_blocks(Wt):   # Wt: (in, 4H), torch column order [i | f | g | o]
        return Wt[:, 0:H], Wt[:, H:2 * H], Wt[:, 2 * H:3 * H], Wt[:, 3 * H:4 * H]

    def pack(i0, i1, f0, f1, o0, o1, g0, g1):   # -> columns [i0 i1 f0 f1 o0 o1 g0 g1]
        return jnp.concatenate([i0, i1, f0, f1, o0, o1, g0, g1], axis=1)

    i0w, f0w, g0w, o0w = gate_blocks(params["wih0"].T)           # (C, 4H)
    zC = jnp.zeros((C, H), jnp.float32)
    Wu_comb = pack(i0w, zC, f0w, zC, o0w, zC, g0w, zC)           # (C, 8H)

    b0 = (params["bih0"] + params["bhh0"]).reshape(1, 4 * H)
    b1 = (params["bih1"] + params["bhh1"]).reshape(1, 4 * H)
    bi0, bf0, bg0, bo0 = gate_blocks(b0)
    bi1, bf1, bg1, bo1 = gate_blocks(b1)
    bias_comb = pack(bi0, bi1, bf0, bf1, bo0, bo1, bg0, bg1)     # (1, 8H)

    ia, fa, ga, oa = gate_blocks(params["whh0"].T)               # h0 -> layer-0 gates
    ib, fb, gb, ob = gate_blocks(params["wih1"].T)               # h0 -> layer-1 gates
    ic, fc, gc_, oc = gate_blocks(params["whh1"].T)              # h1 -> layer-1 gates
    zH = jnp.zeros((H, H), jnp.float32)
    M = jnp.concatenate(
        [pack(ia, ib, fa, fb, oa, ob, ga, gb),
         pack(zH, ic, zH, fc, zH, oc, zH, gc_)], axis=0)         # (2H, 8H)

    # time-major, flattened (T*B, C) control for lane-friendly batched matmuls
    control_flat = jnp.transpose(control, (1, 0, 2)).reshape(Tt * B, C)
    # initial switching state in the T-basis: w0 = T @ s0
    w0 = jnp.dot(state0, Tmat.T)

    args = (
        control_flat, h0, c0,
        Wu_comb, bias_comb, M,
        params["wA"].T, params["bA"].reshape(1, S),
        params["wB"].T, params["bB"].reshape(1, S * C),
        P, E, RT, Tinv.T, params["Cw"].T, w0,
    )

    N = Tt * B
    out_shape = (
        jax.ShapeDtypeStruct((N, O), jnp.float32),               # outputs (row = t*B+b)
        jax.ShapeDtypeStruct((N, S), jnp.float32),               # states, flat
        jax.ShapeDtypeStruct((N, S * S + S * C), jnp.float32),   # [A | B] 128-lane slab
        jax.ShapeDtypeStruct((L, B, H), jnp.float32),            # h_n
        jax.ShapeDtypeStruct((L, B, H), jnp.float32),            # c_n
    )

    outs = pl.pallas_call(
        switching_lstm_kernel,
        out_shape=out_shape,
        scratch_shapes=[pltpu.VMEM((N, H), jnp.float32)],        # layer-1 sequence
    )(*args)

    out_nm, st_nm, AB_nm, hN, cN = outs
    A_nm = AB_nm[:, :S * S]
    B_nm = AB_nm[:, S * S:]
    return dict(
        outputs=out_nm.reshape(Tt, B, O).transpose(1, 0, 2),
        states=st_nm.reshape(Tt, B, S).transpose(1, 0, 2),
        system_matrices=A_nm.reshape(Tt, B, S, S).transpose(1, 0, 2, 3),
        control_matrices=B_nm.reshape(Tt, B, S, C).transpose(1, 0, 2, 3),
        hx=(hN, cN),
    )


# -----------------------------------------------------------------------------
# Pure-JAX reference (mirrors the PyTorch forward exactly)
# -----------------------------------------------------------------------------
def reference_forward(params, control, previous_output):
    B, Tt, C = control.shape
    H, S, O, L = RECURRENT_DIM, STATE_DIM, OUTPUT_DIM, NUM_LAYERS
    hp = lax.Precision.HIGHEST

    h = [jnp.zeros((B, H), jnp.float32) for _ in range(L)]
    c = [jnp.zeros((B, H), jnp.float32) for _ in range(L)]
    x = control
    for layer in range(L):
        wih = params[f"wih{layer}"]
        whh = params[f"whh{layer}"]
        b = params[f"bih{layer}"] + params[f"bhh{layer}"]
        outs = []
        for t in range(Tt):
            g = (jnp.dot(x[:, t], wih.T, precision=hp)
                 + jnp.dot(h[layer], whh.T, precision=hp) + b)
            i = jax.nn.sigmoid(g[:, :H])
            f = jax.nn.sigmoid(g[:, H:2 * H])
            gg = jnp.tanh(g[:, 2 * H:3 * H])
            o = jax.nn.sigmoid(g[:, 3 * H:])
            c[layer] = f * c[layer] + i * gg
            h[layer] = o * jnp.tanh(c[layer])
            outs.append(h[layer])
        x = jnp.stack(outs, axis=1)

    xf = x.reshape(B * Tt, H)
    d = jnp.tanh(jnp.dot(xf, params["wA"].T, precision=hp) + params["bA"])
    Tinv = jnp.linalg.inv(params["T"])
    A = jnp.einsum("ik,nk,kj->nij", Tinv, d, params["T"],
                   precision=hp).reshape(B, Tt, S, S)
    Bm = (jnp.dot(xf, params["wB"].T, precision=hp) + params["bB"]).reshape(B, Tt, S, C)

    state = jnp.zeros((B, S), jnp.float32).at[:, :O].set(previous_output)
    states = []
    for t in range(Tt):
        state = (jnp.einsum("bij,bj->bi", A[:, t], state, precision=hp)
                 + jnp.einsum("bic,bc->bi", Bm[:, t], control[:, t], precision=hp))
        states.append(state)
    states = jnp.stack(states, axis=1)
    outputs = jnp.einsum("bts,os->bto", states, params["Cw"], precision=hp)
    hN = jnp.stack(h, axis=0)
    cN = jnp.stack(c, axis=0)
    return dict(outputs=outputs, states=states, system_matrices=A,
                control_matrices=Bm, hx=(hN, cN))


# -----------------------------------------------------------------------------
if __name__ == "__main__":
    key = jax.random.PRNGKey(0)
    pkey, ckey, okey = jax.random.split(key, 3)

    params = init_params(pkey)
    control = jax.random.normal(ckey, (BATCH, SEQ, CONTROL_DIM), jnp.float32)
    previous_output = jax.random.normal(okey, (BATCH, OUTPUT_DIM), jnp.float32)

    result = stable_switching_lstm_forward(params, control, previous_output)
    jax.block_until_ready(result)

    ref = reference_forward(params, control, previous_output)
    for name in ("outputs", "states", "system_matrices", "control_matrices"):
        assert result[name].shape == ref[name].shape, name
        assert jnp.allclose(result[name], ref[name], atol=2e-3, rtol=2e-3), name
    for a, b in zip(result["hx"], ref["hx"]):
        assert jnp.allclose(a, b, atol=2e-3, rtol=2e-3)

    print("KERNEL_OK")
</pallas_src>

<mosaic_0001>
module attributes {stable_mosaic.version = 11 : i64} {
  func.func @switching_lstm_kernel(%arg0: memref<32x8xf32, #tpu.memory_space<vmem>>, %arg1: memref<2x4x32xf32, #tpu.memory_space<vmem>>, %arg2: memref<2x4x32xf32, #tpu.memory_space<vmem>>, %arg3: memref<8x256xf32, #tpu.memory_space<vmem>>, %arg4: memref<1x256xf32, #tpu.memory_space<vmem>>, %arg5: memref<64x256xf32, #tpu.memory_space<vmem>>, %arg6: memref<32x8xf32, #tpu.memory_space<vmem>>, %arg7: memref<1x8xf32, #tpu.memory_space<vmem>>, %arg8: memref<32x64xf32, #tpu.memory_space<vmem>>, %arg9: memref<1x64xf32, #tpu.memory_space<vmem>>, %arg10: memref<8x64xf32, #tpu.memory_space<vmem>>, %arg11: memref<8x64xf32, #tpu.memory_space<vmem>>, %arg12: memref<64x8xf32, #tpu.memory_space<vmem>>, %arg13: memref<8x8xf32, #tpu.memory_space<vmem>>, %arg14: memref<8x4xf32, #tpu.memory_space<vmem>>, %arg15: memref<4x8xf32, #tpu.memory_space<vmem>>, %arg16: memref<32x4xf32, #tpu.memory_space<vmem>>, %arg17: memref<32x8xf32, #tpu.memory_space<vmem>>, %arg18: memref<32x128xf32, #tpu.memory_space<vmem>>, %arg19: memref<2x4x32xf32, #tpu.memory_space<vmem>>, %arg20: memref<2x4x32xf32, #tpu.memory_space<vmem>>, %arg21: memref<32x32xf32, #tpu.memory_space<vmem>>) attributes {dimension_semantics = [], scalar_prefetch = 0 : i64, scratch_operands = 1 : i64, tpu.core_type = #tpu.core_type<tc>} {
    %c0 = arith.constant 0 : index
    %c0_0 = arith.constant 0 : index
    %0 = vector.load %arg0[%c0, %c0_0] : memref<32x8xf32, #tpu.memory_space<vmem>>, vector<32x8xf32>
    %c0_1 = arith.constant 0 : index
    %c0_2 = arith.constant 0 : index
    %1 = vector.load %arg5[%c0_1, %c0_2] : memref<64x256xf32, #tpu.memory_space<vmem>>, vector<64x256xf32>
    %c0_3 = arith.constant 0 : index
    %c0_4 = arith.constant 0 : index
    %2 = vector.load %arg3[%c0_3, %c0_4] : memref<8x256xf32, #tpu.memory_space<vmem>>, vector<8x256xf32>
    %cst = arith.constant dense<0.000000e+00> : vector<32x256xf32>
    %3 = tpu.matmul %0, %2, %cst {dimension_numbers = #tpu.dot_dimension_numbers<[1], [0], [0], [1], [0, 0, 1, 1], [], []>} : vector<32x8xf32>, vector<8x256xf32>, vector<32x256xf32> -> vector<32x256xf32>
    %c0_5 = arith.constant 0 : index
    %c0_6 = arith.constant 0 : index
    %4 = vector.load %arg4[%c0_5, %c0_6] : memref<1x256xf32, #tpu.memory_space<vmem>>, vector<1x256xf32>
    %5 = vector.broadcast %4 : vector<1x256xf32> to vector<32x256xf32>
    %6 = arith.addf %3, %5 : vector<32x256xf32>
    %c0_7 = arith.constant 0 : index
    %c0_8 = arith.constant 0 : index
    %c0_9 = arith.constant 0 : index
    %7 = vector.load %arg1[%c0_7, %c0_8, %c0_9] : memref<2x4x32xf32, #tpu.memory_space<vmem>>, vector<1x4x32xf32>
    %8 = vector.shape_cast %7 : vector<1x4x32xf32> to vector<4x32xf32>
    %c1 = arith.constant 1 : index
    %c0_10 = arith.constant 0 : index
    %c0_11 = arith.constant 0 : index
    %9 = vector.load %arg1[%c1, %c0_10, %c0_11] : memref<2x4x32xf32, #tpu.memory_space<vmem>>, vector<1x4x32xf32>
    %10 = vector.shape_cast %9 : vector<1x4x32xf32> to vector<4x32xf32>
    %11 = tpu.concatenate %8, %10 in 1 : vector<4x32xf32>, vector<4x32xf32> -> vector<4x64xf32>
    %c0_12 = arith.constant 0 : index
    %c0_13 = arith.constant 0 : index
    %c0_14 = arith.constant 0 : index
    %12 = vector.load %arg2[%c0_12, %c0_13, %c0_14] : memref<2x4x32xf32, #tpu.memory_space<vmem>>, vector<1x4x32xf32>
    %13 = vector.shape_cast %12 : vector<1x4x32xf32> to vector<4x32xf32>
    %c1_15 = arith.constant 1 : index
    %c0_16 = arith.constant 0 : index
    %c0_17 = arith.constant 0 : index
    %14 = vector.load %arg2[%c1_15, %c0_16, %c0_17] : memref<2x4x32xf32, #tpu.memory_space<vmem>>, vector<1x4x32xf32>
    %15 = vector.shape_cast %14 : vector<1x4x32xf32> to vector<4x32xf32>
    %16 = tpu.concatenate %13, %15 in 1 : vector<4x32xf32>, vector<4x32xf32> -> vector<4x64xf32>
    %17 = vector.extract_strided_slice %6 {offsets = [0, 0], sizes = [4, 256], strides = [1, 1]} : vector<32x256xf32> to vector<4x256xf32>
    %cst_18 = arith.constant dense<0.000000e+00> : vector<4x256xf32>
    %18 = tpu.matmul %11, %1, %cst_18 {dimension_numbers = #tpu.dot_dimension_numbers<[1], [0], [0], [1], [0, 0, 1, 1], [], []>} : vector<4x64xf32>, vector<64x256xf32>, vector<4x256xf32> -> vector<4x256xf32>
    %19 = arith.addf %17, %18 : vector<4x256xf32>
    %20 = vector.extract_strided_slice %19 {offsets = [0, 0], sizes = [4, 192], strides = [1, 1]} : vector<4x256xf32> to vector<4x192xf32>
    %21 = arith.negf %20 : vector<4x192xf32>
    %22 = math.exp %21 : vector<4x192xf32>
    %cst_19 = arith.constant 1.000000e+00 : f32
    %23 = vector.broadcast %cst_19 : f32 to vector<4x192xf32>
    %24 = arith.addf %23, %22 : vector<4x192xf32>
    %25 = arith.divf %23, %24 : vector<4x192xf32>
    %26 = vector.extract_strided_slice %19 {offsets = [0, 192], sizes = [4, 64], strides = [1, 1]} : vector<4x256xf32> to vector<4x64xf32>
    %27 = math.tanh %26 : vector<4x64xf32>
    %28 = vector.extract_strided_slice %25 {offsets = [0, 0], sizes = [4, 64], strides = [1, 1]} : vector<4x192xf32> to vector<4x64xf32>
    %29 = vector.extract_strided_slice %25 {offsets = [0, 64], sizes = [4, 64], strides = [1, 1]} : vector<4x192xf32> to vector<4x64xf32>
    %30 = vector.extract_strided_slice %25 {offsets = [0, 128], sizes = [4, 64], strides = [1, 1]} : vector<4x192xf32> to vector<4x64xf32>
    %31 = arith.mulf %29, %16 : vector<4x64xf32>
    %32 = arith.mulf %28, %27 : vector<4x64xf32>
    %33 = arith.addf %31, %32 : vector<4x64xf32>
    %34 = math.tanh %33 : vector<4x64xf32>
    %35 = arith.mulf %30, %34 : vector<4x64xf32>
    %36 = vector.extract_strided_slice %35 {offsets = [0, 0], sizes = [4, 32], strides = [1, 1]} : vector<4x64xf32> to vector<4x32xf32>
    %37 = vector.extract_strided_slice %11 {offsets = [0, 32], sizes = [4, 32], strides = [1, 1]} : vector<4x64xf32> to vector<4x32xf32>
    %38 = tpu.concatenate %36, %37 in 1 : vector<4x32xf32>, vector<4x32xf32> -> vector<4x64xf32>
    %39 = vector.extract_strided_slice %33 {offsets = [0, 0], sizes = [4, 32], strides = [1, 1]} : vector<4x64xf32> to vector<4x32xf32>
    %40 = vector.extract_strided_slice %16 {offsets = [0, 32], sizes = [4, 32], strides = [1, 1]} : vector<4x64xf32> to vector<4x32xf32>
    %41 = tpu.concatenate %39, %40 in 1 : vector<4x32xf32>, vector<4x32xf32> -> vector<4x64xf32>
    %42 = vector.extract_strided_slice %6 {offsets = [4, 0], sizes = [4, 256], strides = [1, 1]} : vector<32x256xf32> to vector<4x256xf32>
    %cst_20 = arith.constant dense<0.000000e+00> : vector<4x256xf32>
    %43 = tpu.matmul %38, %1, %cst_20 {dimension_numbers = #tpu.dot_dimension_numbers<[1], [0], [0], [1], [0, 0, 1, 1], [], []>} : vector<4x64xf32>, vector<64x256xf32>, vector<4x256xf32> -> vector<4x256xf32>
    %44 = arith.addf %42, %43 : vector<4x256xf32>
    %45 = vector.extract_strided_slice %44 {offsets = [0, 0], sizes = [4, 192], strides = [1, 1]} : vector<4x256xf32> to vector<4x192xf32>
    %46 = arith.negf %45 : vector<4x192xf32>
    %47 = math.exp %46 : vector<4x192xf32>
    %cst_21 = arith.constant 1.000000e+00 : f32
    %48 = vector.broadcast %cst_21 : f32 to vector<4x192xf32>
    %49 = arith.addf %48, %47 : vector<4x192xf32>
    %50 = arith.divf %48, %49 : vector<4x192xf32>
    %51 = vector.extract_strided_slice %44 {offsets = [0, 192], sizes = [4, 64], strides = [1, 1]} : vector<4x256xf32> to vector<4x64xf32>
    %52 = math.tanh %51 : vector<4x64xf32>
    %53 = vector.extract_strided_slice %50 {offsets = [0, 0], sizes = [4, 64], strides = [1, 1]} : vector<4x192xf32> to vector<4x64xf32>
    %54 = vector.extract_strided_slice %50 {offsets = [0, 64], sizes = [4, 64], strides = [1, 1]} : vector<4x192xf32> to vector<4x64xf32>
    %55 = vector.extract_strided_slice %50 {offsets = [0, 128], sizes = [4, 64], strides = [1, 1]} : vector<4x192xf32> to vector<4x64xf32>
    %56 = arith.mulf %54, %41 : vector<4x64xf32>
    %57 = arith.mulf %53, %52 : vector<4x64xf32>
    %58 = arith.addf %56, %57 : vector<4x64xf32>
    %59 = math.tanh %58 : vector<4x64xf32>
    %60 = arith.mulf %55, %59 : vector<4x64xf32>
    %61 = vector.extract_strided_slice %60 {offsets = [0, 32], sizes = [4, 32], strides = [1, 1]} : vector<4x64xf32> to vector<4x32xf32>
    %c0_22 = arith.constant 0 : index
    %c0_23 = arith.constant 0 : index
    %62 = vector.load %arg21[%c0_22, %c0_23] : memref<32x32xf32, #tpu.memory_space<vmem>>, vector<4x32xf32>
    tpu.vector_store %arg21[%c0_22, %c0_23], %61 {strides = array<i32>} : memref<32x32xf32, #tpu.memory_space<vmem>>, vector<4x32xf32>,
    %63 = vector.extract_strided_slice %6 {offsets = [8, 0], sizes = [4, 256], strides = [1, 1]} : vector<32x256xf32> to vector<4x256xf32>
    %cst_24 = arith.constant dense<0.000000e+00> : vector<4x256xf32>
    %64 = tpu.matmul %60, %1, %cst_24 {dimension_numbers = #tpu.dot_dimension_numbers<[1], [0], [0], [1], [0, 0, 1, 1], [], []>} : vector<4x64xf32>, vector<64x256xf32>, vector<4x256xf32> -> vector<4x256xf32>
    %65 = arith.addf %63, %64 : vector<4x256xf32>
    %66 = vector.extract_strided_slice %65 {offsets = [0, 0], sizes = [4, 192], strides = [1, 1]} : vector<4x256xf32> to vector<4x192xf32>
    %67 = arith.negf %66 : vector<4x192xf32>
    %68 = math.exp %67 : vector<4x192xf32>
    %cst_25 = arith.constant 1.000000e+00 : f32
    %69 = vector.broadcast %cst_25 : f32 to vector<4x192xf32>
    %70 = arith.addf %69, %68 : vector<4x192xf32>
    %71 = arith.divf %69, %70 : vector<4x192xf32>
    %72 = vector.extract_strided_slice %65 {offsets = [0, 192], sizes = [4, 64], strides = [1, 1]} : vector<4x256xf32> to vector<4x64xf32>
    %73 = math.tanh %72 : vector<4x64xf32>
    %74 = vector.extract_strided_slice %71 {offsets = [0, 0], sizes = [4, 64], strides = [1, 1]} : vector<4x192xf32> to vector<4x64xf32>
    %75 = vector.extract_strided_slice %71 {offsets = [0, 64], sizes = [4, 64], strides = [1, 1]} : vector<4x192xf32> to vector<4x64xf32>
    %76 = vector.extract_strided_slice %71 {offsets = [0, 128], sizes = [4, 64], strides = [1, 1]} : vector<4x192xf32> to vector<4x64xf32>
    %77 = arith.mulf %75, %58 : vector<4x64xf32>
    %78 = arith.mulf %74, %73 : vector<4x64xf32>
    %79 = arith.addf %77, %78 : vector<4x64xf32>
    %80 = math.tanh %79 : vector<4x64xf32>
    %81 = arith.mulf %76, %80 : vector<4x64xf32>
    %82 = vector.extract_strided_slice %81 {offsets = [0, 32], sizes = [4, 32], strides = [1, 1]} : vector<4x64xf32> to vector<4x32xf32>
    %c4 = arith.constant 4 : index
    %c0_26 = arith.constant 0 : index
    %83 = vector.load %arg21[%c4, %c0_26] : memref<32x32xf32, #tpu.memory_space<vmem>>, vector<4x32xf32>
    tpu.vector_store %arg21[%c4, %c0_26], %82 {strides = array<i32>} : memref<32x32xf32, #tpu.memory_space<vmem>>, vector<4x32xf32>,
    %84 = vector.extract_strided_slice %6 {offsets = [12, 0], sizes = [4, 256], strides = [1, 1]} : vector<32x256xf32> to vector<4x256xf32>
    %cst_27 = arith.constant dense<0.000000e+00> : vector<4x256xf32>
    %85 = tpu.matmul %81, %1, %cst_27 {dimension_numbers = #tpu.dot_dimension_numbers<[1], [0], [0], [1], [0, 0, 1, 1], [], []>} : vector<4x64xf32>, vector<64x256xf32>, vector<4x256xf32> -> vector<4x256xf32>
    %86 = arith.addf %84, %85 : vector<4x256xf32>
    %87 = vector.extract_strided_slice %86 {offsets = [0, 0], sizes = [4, 192], strides = [1, 1]} : vector<4x256xf32> to vector<4x192xf32>
    %88 = arith.negf %87 : vector<4x192xf32>
    %89 = math.exp %88 : vector<4x192xf32>
    %cst_28 = arith.constant 1.000000e+00 : f32
    %90 = vector.broadcast %cst_28 : f32 to vector<4x192xf32>
    %91 = arith.addf %90, %89 : vector<4x192xf32>
    %92 = arith.divf %90, %91 : vector<4x192xf32>
    %93 = vector.extract_strided_slice %86 {offsets = [0, 192], sizes = [4, 64], strides = [1, 1]} : vector<4x256xf32> to vector<4x64xf32>
    %94 = math.tanh %93 : vector<4x64xf32>
    %95 = vector.extract_strided_slice %92 {offsets = [0, 0], sizes = [4, 64], strides = [1, 1]} : vector<4x192xf32> to vector<4x64xf32>
    %96 = vector.extract_strided_slice %92 {offsets = [0, 64], sizes = [4, 64], strides = [1, 1]} : vector<4x192xf32> to vector<4x64xf32>
    %97 = vector.extract_strided_slice %92 {offsets = [0, 128], sizes = [4, 64], strides = [1, 1]} : vector<4x192xf32> to vector<4x64xf32>
    %98 = arith.mulf %96, %79 : vector<4x64xf32>
    %99 = arith.mulf %95, %94 : vector<4x64xf32>
    %100 = arith.addf %98, %99 : vector<4x64xf32>
    %101 = math.tanh %100 : vector<4x64xf32>
    %102 = arith.mulf %97, %101 : vector<4x64xf32>
    %103 = vector.extract_strided_slice %102 {offsets = [0, 32], sizes = [4, 32], strides = [1, 1]} : vector<4x64xf32> to vector<4x32xf32>
    %c8 = arith.constant 8 : index
    %c0_29 = arith.constant 0 : index
    %104 = vector.load %arg21[%c8, %c0_29] : memref<32x32xf32, #tpu.memory_space<vmem>>, vector<4x32xf32>
    tpu.vector_store %arg21[%c8, %c0_29], %103 {strides = array<i32>} : memref<32x32xf32, #tpu.memory_space<vmem>>, vector<4x32xf32>,
    %105 = vector.extract_strided_slice %6 {offsets = [16, 0], sizes = [4, 256], strides = [1, 1]} : vector<32x256xf32> to vector<4x256xf32>
    %cst_30 = arith.constant dense<0.000000e+00> : vector<4x256xf32>
    %106 = tpu.matmul %102, %1, %cst_30 {dimension_numbers = #tpu.dot_dimension_numbers<[1], [0], [0], [1], [0, 0, 1, 1], [], []>} : vector<4x64xf32>, vector<64x256xf32>, vector<4x256xf32> -> vector<4x256xf32>
    %107 = arith.addf %105, %106 : vector<4x256xf32>
    %108 = vector.extract_strided_slice %107 {offsets = [0, 0], sizes = [4, 192], strides = [1, 1]} : vector<4x256xf32> to vector<4x192xf32>
    %109 = arith.negf %108 : vector<4x192xf32>
    %110 = math.exp %109 : vector<4x192xf32>
    %cst_31 = arith.constant 1.000000e+00 : f32
    %111 = vector.broadcast %cst_31 : f32 to vector<4x192xf32>
    %112 = arith.addf %111, %110 : vector<4x192xf32>
    %113 = arith.divf %111, %112 : vector<4x192xf32>
    %114 = vector.extract_strided_slice %107 {offsets = [0, 192], sizes = [4, 64], strides = [1, 1]} : vector<4x256xf32> to vector<4x64xf32>
    %115 = math.tanh %114 : vector<4x64xf32>
    %116 = vector.extract_strided_slice %113 {offsets = [0, 0], sizes = [4, 64], strides = [1, 1]} : vector<4x192xf32> to vector<4x64xf32>
    %117 = vector.extract_strided_slice %113 {offsets = [0, 64], sizes = [4, 64], strides = [1, 1]} : vector<4x192xf32> to vector<4x64xf32>
    %118 = vector.extract_strided_slice %113 {offsets = [0, 128], sizes = [4, 64], strides = [1, 1]} : vector<4x192xf32> to vector<4x64xf32>
    %119 = arith.mulf %117, %100 : vector<4x64xf32>
    %120 = arith.mulf %116, %115 : vector<4x64xf32>
    %121 = arith.addf %119, %120 : vector<4x64xf32>
    %122 = math.tanh %121 : vector<4x64xf32>
    %123 = arith.mulf %118, %122 : vector<4x64xf32>
    %124 = vector.extract_strided_slice %123 {offsets = [0, 32], sizes = [4, 32], strides = [1, 1]} : vector<4x64xf32> to vector<4x32xf32>
    %c12 = arith.constant 12 : index
    %c0_32 = arith.constant 0 : index
    %125 = vector.load %arg21[%c12, %c0_32] : memref<32x32xf32, #tpu.memory_space<vmem>>, vector<4x32xf32>
    tpu.vector_store %arg21[%c12, %c0_32], %124 {strides = array<i32>} : memref<32x32xf32, #tpu.memory_space<vmem>>, vector<4x32xf32>,
    %126 = vector.extract_strided_slice %6 {offsets = [20, 0], sizes = [4, 256], strides = [1, 1]} : vector<32x256xf32> to vector<4x256xf32>
    %cst_33 = arith.constant dense<0.000000e+00> : vector<4x256xf32>
    %127 = tpu.matmul %123, %1, %cst_33 {dimension_numbers = #tpu.dot_dimension_numbers<[1], [0], [0], [1], [0, 0, 1, 1], [], []>} : vector<4x64xf32>, vector<64x256xf32>, vector<4x256xf32> -> vector<4x256xf32>
    %128 = arith.addf %126, %127 : vector<4x256xf32>
    %129 = vector.extract_strided_slice %128 {offsets = [0, 0], sizes = [4, 192], strides = [1, 1]} : vector<4x256xf32> to vector<4x192xf32>
    %130 = arith.negf %129 : vector<4x192xf32>
    %131 = math.exp %130 : vector<4x192xf32>
    %cst_34 = arith.constant 1.000000e+00 : f32
    %132 = vector.broadcast %cst_34 : f32 to vector<4x192xf32>
    %133 = arith.addf %132, %131 : vector<4x192xf32>
    %134 = arith.divf %132, %133 : vector<4x192xf32>
    %135 = vector.extract_strided_slice %128 {offsets = [0, 192], sizes = [4, 64], strides = [1, 1]} : vector<4x256xf32> to vector<4x64xf32>
    %136 = math.tanh %135 : vector<4x64xf32>
    %137 = vector.extract_strided_slice %134 {offsets = [0, 0], sizes = [4, 64], strides = [1, 1]} : vector<4x192xf32> to vector<4x64xf32>
    %138 = vector.extract_strided_slice %134 {offsets = [0, 64], sizes = [4, 64], strides = [1, 1]} : vector<4x192xf32> to vector<4x64xf32>
    %139 = vector.extract_strided_slice %134 {offsets = [0, 128], sizes = [4, 64], strides = [1, 1]} : vector<4x192xf32> to vector<4x64xf32>
    %140 = arith.mulf %138, %121 : vector<4x64xf32>
    %141 = arith.mulf %137, %136 : vector<4x64xf32>
    %142 = arith.addf %140, %141 : vector<4x64xf32>
    %143 = math.tanh %142 : vector<4x64xf32>
    %144 = arith.mulf %139, %143 : vector<4x64xf32>
    %145 = vector.extract_strided_slice %144 {offsets = [0, 32], sizes = [4, 32], strides = [1, 1]} : vector<4x64xf32> to vector<4x32xf32>
    %c16 = arith.constant 16 : index
    %c0_35 = arith.constant 0 : index
    %146 = vector.load %arg21[%c16, %c0_35] : memref<32x32xf32, #tpu.memory_space<vmem>>, vector<4x32xf32>
    tpu.vector_store %arg21[%c16, %c0_35], %145 {strides = array<i32>} : memref<32x32xf32, #tpu.memory_space<vmem>>, vector<4x32xf32>,
    %147 = vector.extract_strided_slice %6 {offsets = [24, 0], sizes = [4, 256], strides = [1, 1]} : vector<32x256xf32> to vector<4x256xf32>
    %cst_36 = arith.constant dense<0.000000e+00> : vector<4x256xf32>
    %148 = tpu.matmul %144, %1, %cst_36 {dimension_numbers = #tpu.dot_dimension_numbers<[1], [0], [0], [1], [0, 0, 1, 1], [], []>} : vector<4x64xf32>, vector<64x256xf32>, vector<4x256xf32> -> vector<4x256xf32>
    %149 = arith.addf %147, %148 : vector<4x256xf32>
    %150 = vector.extract_strided_slice %149 {offsets = [0, 0], sizes = [4, 192], strides = [1, 1]} : vector<4x256xf32> to vector<4x192xf32>
    %151 = arith.negf %150 : vector<4x192xf32>
    %152 = math.exp %151 : vector<4x192xf32>
    %cst_37 = arith.constant 1.000000e+00 : f32
    %153 = vector.broadcast %cst_37 : f32 to vector<4x192xf32>
    %154 = arith.addf %153, %152 : vector<4x192xf32>
    %155 = arith.divf %153, %154 : vector<4x192xf32>
    %156 = vector.extract_strided_slice %149 {offsets = [0, 192], sizes = [4, 64], strides = [1, 1]} : vector<4x256xf32> to vector<4x64xf32>
    %157 = math.tanh %156 : vector<4x64xf32>
    %158 = vector.extract_strided_slice %155 {offsets = [0, 0], sizes = [4, 64], strides = [1, 1]} : vector<4x192xf32> to vector<4x64xf32>
    %159 = vector.extract_strided_slice %155 {offsets = [0, 64], sizes = [4, 64], strides = [1, 1]} : vector<4x192xf32> to vector<4x64xf32>
    %160 = vector.extract_strided_slice %155 {offsets = [0, 128], sizes = [4, 64], strides = [1, 1]} : vector<4x192xf32> to vector<4x64xf32>
    %161 = arith.mulf %159, %142 : vector<4x64xf32>
    %162 = arith.mulf %158, %157 : vector<4x64xf32>
    %163 = arith.addf %161, %162 : vector<4x64xf32>
    %164 = math.tanh %163 : vector<4x64xf32>
    %165 = arith.mulf %160, %164 : vector<4x64xf32>
    %166 = vector.extract_strided_slice %165 {offsets = [0, 32], sizes = [4, 32], strides = [1, 1]} : vector<4x64xf32> to vector<4x32xf32>
    %c20 = arith.constant 20 : index
    %c0_38 = arith.constant 0 : index
    %167 = vector.load %arg21[%c20, %c0_38] : memref<32x32xf32, #tpu.memory_space<vmem>>, vector<4x32xf32>
    tpu.vector_store %arg21[%c20, %c0_38], %166 {strides = array<i32>} : memref<32x32xf32, #tpu.memory_space<vmem>>, vector<4x32xf32>,
    %168 = vector.extract_strided_slice %6 {offsets = [28, 0], sizes = [4, 256], strides = [1, 1]} : vector<32x256xf32> to vector<4x256xf32>
    %cst_39 = arith.constant dense<0.000000e+00> : vector<4x256xf32>
    %169 = tpu.matmul %165, %1, %cst_39 {dimension_numbers = #tpu.dot_dimension_numbers<[1], [0], [0], [1], [0, 0, 1, 1], [], []>} : vector<4x64xf32>, vector<64x256xf32>, vector<4x256xf32> -> vector<4x256xf32>
    %170 = arith.addf %168, %169 : vector<4x256xf32>
    %171 = vector.extract_strided_slice %170 {offsets = [0, 0], sizes = [4, 192], strides = [1, 1]} : vector<4x256xf32> to vector<4x192xf32>
    %172 = arith.negf %171 : vector<4x192xf32>
    %173 = math.exp %172 : vector<4x192xf32>
    %cst_40 = arith.constant 1.000000e+00 : f32
    %174 = vector.broadcast %cst_40 : f32 to vector<4x192xf32>
    %175 = arith.addf %174, %173 : vector<4x192xf32>
    %176 = arith.divf %174, %175 : vector<4x192xf32>
    %177 = vector.extract_strided_slice %170 {offsets = [0, 192], sizes = [4, 64], strides = [1, 1]} : vector<4x256xf32> to vector<4x64xf32>
    %178 = math.tanh %177 : vector<4x64xf32>
    %179 = vector.extract_strided_slice %176 {offsets = [0, 0], sizes = [4, 64], strides = [1, 1]} : vector<4x192xf32> to vector<4x64xf32>
    %180 = vector.extract_strided_slice %176 {offsets = [0, 64], sizes = [4, 64], strides = [1, 1]} : vector<4x192xf32> to vector<4x64xf32>
    %181 = vector.extract_strided_slice %176 {offsets = [0, 128], sizes = [4, 64], strides = [1, 1]} : vector<4x192xf32> to vector<4x64xf32>
    %182 = arith.mulf %180, %163 : vector<4x64xf32>
    %183 = arith.mulf %179, %178 : vector<4x64xf32>
    %184 = arith.addf %182, %183 : vector<4x64xf32>
    %185 = math.tanh %184 : vector<4x64xf32>
    %186 = arith.mulf %181, %185 : vector<4x64xf32>
    %187 = vector.extract_strided_slice %186 {offsets = [0, 32], sizes = [4, 32], strides = [1, 1]} : vector<4x64xf32> to vector<4x32xf32>
    %c24 = arith.constant 24 : index
    %c0_41 = arith.constant 0 : index
    %188 = vector.load %arg21[%c24, %c0_41] : memref<32x32xf32, #tpu.memory_space<vmem>>, vector<4x32xf32>
    tpu.vector_store %arg21[%c24, %c0_41], %187 {strides = array<i32>} : memref<32x32xf32, #tpu.memory_space<vmem>>, vector<4x32xf32>,
    %189 = vector.extract_strided_slice %186 {offsets = [0, 0], sizes = [4, 32], strides = [1, 1]} : vector<4x64xf32> to vector<4x32xf32>
    %c0_42 = arith.constant 0 : index
    %c0_43 = arith.constant 0 : index
    %c0_44 = arith.constant 0 : index
    %190 = vector.load %arg19[%c0_42, %c0_43, %c0_44] : memref<2x4x32xf32, #tpu.memory_space<vmem>>, vector<1x4x32xf32>
    %191 = vector.shape_cast %190 : vector<1x4x32xf32> to vector<4x32xf32>
    %192 = vector.shape_cast %189 : vector<4x32xf32> to vector<1x4x32xf32>
    tpu.vector_store %arg19[%c0_42, %c0_43, %c0_44], %192 {strides = array<i32>} : memref<2x4x32xf32, #tpu.memory_space<vmem>>, vector<1x4x32xf32>,
    %193 = vector.extract_strided_slice %184 {offsets = [0, 0], sizes = [4, 32], strides = [1, 1]} : vector<4x64xf32> to vector<4x32xf32>
    %c0_45 = arith.constant 0 : index
    %c0_46 = arith.constant 0 : index
    %c0_47 = arith.constant 0 : index
    %194 = vector.load %arg20[%c0_45, %c0_46, %c0_47] : memref<2x4x32xf32, #tpu.memory_space<vmem>>, vector<1x4x32xf32>
    %195 = vector.shape_cast %194 : vector<1x4x32xf32> to vector<4x32xf32>
    %196 = vector.shape_cast %193 : vector<4x32xf32> to vector<1x4x32xf32>
    tpu.vector_store %arg20[%c0_45, %c0_46, %c0_47], %196 {strides = array<i32>} : memref<2x4x32xf32, #tpu.memory_space<vmem>>, vector<1x4x32xf32>,
    %197 = vector.extract_strided_slice %6 {offsets = [28, 0], sizes = [4, 256], strides = [1, 1]} : vector<32x256xf32> to vector<4x256xf32>
    %cst_48 = arith.constant dense<0.000000e+00> : vector<4x256xf32>
    %198 = tpu.matmul %186, %1, %cst_48 {dimension_numbers = #tpu.dot_dimension_numbers<[1], [0], [0], [1], [0, 0, 1, 1], [], []>} : vector<4x64xf32>, vector<64x256xf32>, vector<4x256xf32> -> vector<4x256xf32>
    %199 = arith.addf %197, %198 : vector<4x256xf32>
    %200 = vector.extract_strided_slice %199 {offsets = [0, 0], sizes = [4, 192], strides = [1, 1]} : vector<4x256xf32> to vector<4x192xf32>
    %201 = arith.negf %200 : vector<4x192xf32>
    %202 = math.exp %201 : vector<4x192xf32>
    %cst_49 = arith.constant 1.000000e+00 : f32
    %203 = vector.broadcast %cst_49 : f32 to vector<4x192xf32>
    %204 = arith.addf %203, %202 : vector<4x192xf32>
    %205 = arith.divf %203, %204 : vector<4x192xf32>
    %206 = vector.extract_strided_slice %199 {offsets = [0, 192], sizes = [4, 64], strides = [1, 1]} : vector<4x256xf32> to vector<4x64xf32>
    %207 = math.tanh %206 : vector<4x64xf32>
    %208 = vector.extract_strided_slice %205 {offsets = [0, 0], sizes = [4, 64], strides = [1, 1]} : vector<4x192xf32> to vector<4x64xf32>
    %209 = vector.extract_strided_slice %205 {offsets = [0, 64], sizes = [4, 64], strides = [1, 1]} : vector<4x192xf32> to vector<4x64xf32>
    %210 = vector.extract_strided_slice %205 {offsets = [0, 128], sizes = [4, 64], strides = [1, 1]} : vector<4x192xf32> to vector<4x64xf32>
    %211 = arith.mulf %209, %184 : vector<4x64xf32>
    %212 = arith.mulf %208, %207 : vector<4x64xf32>
    %213 = arith.addf %211, %212 : vector<4x64xf32>
    %214 = math.tanh %213 : vector<4x64xf32>
    %215 = arith.mulf %210, %214 : vector<4x64xf32>
    %216 = vector.extract_strided_slice %215 {offsets = [0, 32], sizes = [4, 32], strides = [1, 1]} : vector<4x64xf32> to vector<4x32xf32>
    %c28 = arith.constant 28 : index
    %c0_50 = arith.constant 0 : index
    %217 = vector.load %arg21[%c28, %c0_50] : memref<32x32xf32, #tpu.memory_space<vmem>>, vector<4x32xf32>
    tpu.vector_store %arg21[%c28, %c0_50], %216 {strides = array<i32>} : memref<32x32xf32, #tpu.memory_space<vmem>>, vector<4x32xf32>,
    %218 = vector.extract_strided_slice %215 {offsets = [0, 32], sizes = [4, 32], strides = [1, 1]} : vector<4x64xf32> to vector<4x32xf32>
    %c1_51 = arith.constant 1 : index
    %c0_52 = arith.constant 0 : index
    %c0_53 = arith.constant 0 : index
    %219 = vector.load %arg19[%c1_51, %c0_52, %c0_53] : memref<2x4x32xf32, #tpu.memory_space<vmem>>, vector<1x4x32xf32>
    %220 = vector.shape_cast %219 : vector<1x4x32xf32> to vector<4x32xf32>
    %221 = vector.shape_cast %218 : vector<4x32xf32> to vector<1x4x32xf32>
    tpu.vector_store %arg19[%c1_51, %c0_52, %c0_53], %221 {strides = array<i32>} : memref<2x4x32xf32, #tpu.memory_space<vmem>>, vector<1x4x32xf32>,
    %222 = vector.extract_strided_slice %213 {offsets = [0, 32], sizes = [4, 32], strides = [1, 1]} : vector<4x64xf32> to vector<4x32xf32>
    %c1_54 = arith.constant 1 : index
    %c0_55 = arith.constant 0 : index
    %c0_56 = arith.constant 0 : index
    %223 = vector.load %arg20[%c1_54, %c0_55, %c0_56] : memref<2x4x32xf32, #tpu.memory_space<vmem>>, vector<1x4x32xf32>
    %224 = vector.shape_cast %223 : vector<1x4x32xf32> to vector<4x32xf32>
    %225 = vector.shape_cast %222 : vector<4x32xf32> to vector<1x4x32xf32>
    tpu.vector_store %arg20[%c1_54, %c0_55, %c0_56], %225 {strides = array<i32>} : memref<2x4x32xf32, #tpu.memory_space<vmem>>, vector<1x4x32xf32>,
    %c0_57 = arith.constant 0 : index
    %c0_58 = arith.constant 0 : index
    %226 = vector.load %arg21[%c0_57, %c0_58] : memref<32x32xf32, #tpu.memory_space<vmem>>, vector<32x32xf32>
    %c0_59 = arith.constant 0 : index
    %c0_60 = arith.constant 0 : index
    %227 = vector.load %arg6[%c0_59, %c0_60] : memref<32x8xf32, #tpu.memory_space<vmem>>, vector<32x8xf32>
    %cst_61 = arith.constant dense<0.000000e+00> : vector<32x8xf32>
    %228 = tpu.matmul %226, %227, %cst_61 {dimension_numbers = #tpu.dot_dimension_numbers<[1], [0], [0], [1], [0, 0, 1, 1], [], []>} : vector<32x32xf32>, vector<32x8xf32>, vector<32x8xf32> -> vector<32x8xf32>
    %c0_62 = arith.constant 0 : index
    %c0_63 = arith.constant 0 : index
    %229 = vector.load %arg7[%c0_62, %c0_63] : memref<1x8xf32, #tpu.memory_space<vmem>>, vector<1x8xf32>
    %230 = vector.broadcast %229 : vector<1x8xf32> to vector<32x8xf32>
    %231 = arith.addf %228, %230 : vector<32x8xf32>
    %232 = math.tanh %231 : vector<32x8xf32>
    %c0_64 = arith.constant 0 : index
    %c0_65 = arith.constant 0 : index
    %233 = vector.load %arg8[%c0_64, %c0_65] : memref<32x64xf32, #tpu.memory_space<vmem>>, vector<32x64xf32>
    %cst_66 = arith.constant dense<0.000000e+00> : vector<32x64xf32>
    %234 = tpu.matmul %226, %233, %cst_66 {dimension_numbers = #tpu.dot_dimension_numbers<[1], [0], [0], [1], [0, 0, 1, 1], [], []>} : vector<32x32xf32>, vector<32x64xf32>, vector<32x64xf32> -> vector<32x64xf32>
    %c0_67 = arith.constant 0 : index
    %c0_68 = arith.constant 0 : index
    %235 = vector.load %arg9[%c0_67, %c0_68] : memref<1x64xf32, #tpu.memory_space<vmem>>, vector<1x64xf32>
    %236 = vector.broadcast %235 : vector<1x64xf32> to vector<32x64xf32>
    %237 = arith.addf %234, %236 : vector<32x64xf32>
    %c0_69 = arith.constant 0 : index
    %c0_70 = arith.constant 0 : index
    %238 = vector.load %arg10[%c0_69, %c0_70] : memref<8x64xf32, #tpu.memory_space<vmem>>, vector<8x64xf32>
    %cst_71 = arith.constant dense<0.000000e+00> : vector<32x64xf32>
    %239 = tpu.matmul %232, %238, %cst_71 {dimension_numbers = #tpu.dot_dimension_numbers<[1], [0], [0], [1], [0, 0, 1, 1], [], []>} : vector<32x8xf32>, vector<8x64xf32>, vector<32x64xf32> -> vector<32x64xf32>
    %240 = tpu.concatenate %239, %237 in 1 : vector<32x64xf32>, vector<32x64xf32> -> vector<32x128xf32>
    %c0_72 = arith.constant 0 : index
    %c0_73 = arith.constant 0 : index
    %241 = vector.load %arg18[%c0_72, %c0_73] : memref<32x128xf32, #tpu.memory_space<vmem>>, vector<32x128xf32>
    tpu.vector_store %arg18[%c0_72, %c0_73], %240 {strides = array<i32>} : memref<32x128xf32, #tpu.memory_space<vmem>>, vector<32x128xf32>,
    %c0_74 = arith.constant 0 : index
    %c0_75 = arith.constant 0 : index
    %242 = vector.load %arg11[%c0_74, %c0_75] : memref<8x64xf32, #tpu.memory_space<vmem>>, vector<8x64xf32>
    %cst_76 = arith.constant dense<0.000000e+00> : vector<32x64xf32>
    %243 = tpu.matmul %0, %242, %cst_76 {dimension_numbers = #tpu.dot_dimension_numbers<[1], [0], [0], [1], [0, 0, 1, 1], [], []>} : vector<32x8xf32>, vector<8x64xf32>, vector<32x64xf32> -> vector<32x64xf32>
    %244 = arith.mulf %237, %243 : vector<32x64xf32>
    %c0_77 = arith.constant 0 : index
    %c0_78 = arith.constant 0 : index
    %245 = vector.load %arg12[%c0_77, %c0_78] : memref<64x8xf32, #tpu.memory_space<vmem>>, vector<64x8xf32>
    %cst_79 = arith.constant dense<0.000000e+00> : vector<32x8xf32>
    %246 = tpu.matmul %244, %245, %cst_79 {dimension_numbers = #tpu.dot_dimension_numbers<[1], [0], [0], [1], [0, 0, 1, 1], [], []>} : vector<32x64xf32>, vector<64x8xf32>, vector<32x8xf32> -> vector<32x8xf32>
    %c0_80 = arith.constant 0 : index
    %c0_81 = arith.constant 0 : index
    %247 = vector.load %arg15[%c0_80, %c0_81] : memref<4x8xf32, #tpu.memory_space<vmem>>, vector<4x8xf32>
    %248 = vector.extract_strided_slice %232 {offsets = [0, 0], sizes = [4, 8], strides = [1, 1]} : vector<32x8xf32> to vector<4x8xf32>
    %249 = arith.mulf %248, %247 : vector<4x8xf32>
    %250 = vector.extract_strided_slice %246 {offsets = [0, 0], sizes = [4, 8], strides = [1, 1]} : vector<32x8xf32> to vector<4x8xf32>
    %251 = arith.addf %249, %250 : vector<4x8xf32>
    %252 = vector.extract_strided_slice %232 {offsets = [4, 0], sizes = [4, 8], strides = [1, 1]} : vector<32x8xf32> to vector<4x8xf32>
    %253 = arith.mulf %252, %251 : vector<4x8xf32>
    %254 = vector.extract_strided_slice %246 {offsets = [4, 0], sizes = [4, 8], strides = [1, 1]} : vector<32x8xf32> to vector<4x8xf32>
    %255 = arith.addf %253, %254 : vector<4x8xf32>
    %256 = vector.extract_strided_slice %232 {offsets = [8, 0], sizes = [4, 8], strides = [1, 1]} : vector<32x8xf32> to vector<4x8xf32>
    %257 = arith.mulf %256, %255 : vector<4x8xf32>
    %258 = vector.extract_strided_slice %246 {offsets = [8, 0], sizes = [4, 8], strides = [1, 1]} : vector<32x8xf32> to vector<4x8xf32>
    %259 = arith.addf %257, %258 : vector<4x8xf32>
    %260 = vector.extract_strided_slice %232 {offsets = [12, 0], sizes = [4, 8], strides = [1, 1]} : vector<32x8xf32> to vector<4x8xf32>
    %261 = arith.mulf %260, %259 : vector<4x8xf32>
    %262 = vector.extract_strided_slice %246 {offsets = [12, 0], sizes = [4, 8], strides = [1, 1]} : vector<32x8xf32> to vector<4x8xf32>
    %263 = arith.addf %261, %262 : vector<4x8xf32>
    %264 = vector.extract_strided_slice %232 {offsets = [16, 0], sizes = [4, 8], strides = [1, 1]} : vector<32x8xf32> to vector<4x8xf32>
    %265 = arith.mulf %264, %263 : vector<4x8xf32>
    %266 = vector.extract_strided_slice %246 {offsets = [16, 0], sizes = [4, 8], strides = [1, 1]} : vector<32x8xf32> to vector<4x8xf32>
    %267 = arith.addf %265, %266 : vector<4x8xf32>
    %268 = vector.extract_strided_slice %232 {offsets = [20, 0], sizes = [4, 8], strides = [1, 1]} : vector<32x8xf32> to vector<4x8xf32>
    %269 = arith.mulf %268, %267 : vector<4x8xf32>
    %270 = vector.extract_strided_slice %246 {offsets = [20, 0], sizes = [4, 8], strides = [1, 1]} : vector<32x8xf32> to vector<4x8xf32>
    %271 = arith.addf %269, %270 : vector<4x8xf32>
    %272 = vector.extract_strided_slice %232 {offsets = [24, 0], sizes = [4, 8], strides = [1, 1]} : vector<32x8xf32> to vector<4x8xf32>
    %273 = arith.mulf %272, %271 : vector<4x8xf32>
    %274 = vector.extract_strided_slice %246 {offsets = [24, 0], sizes = [4, 8], strides = [1, 1]} : vector<32x8xf32> to vector<4x8xf32>
    %275 = arith.addf %273, %274 : vector<4x8xf32>
    %276 = vector.extract_strided_slice %232 {offsets = [28, 0], sizes = [4, 8], strides = [1, 1]} : vector<32x8xf32> to vector<4x8xf32>
    %277 = arith.mulf %276, %275 : vector<4x8xf32>
    %278 = vector.extract_strided_slice %246 {offsets = [28, 0], sizes = [4, 8], strides = [1, 1]} : vector<32x8xf32> to vector<4x8xf32>
    %279 = arith.addf %277, %278 : vector<4x8xf32>
    %280 = tpu.concatenate %251, %255, %259, %263, %267, %271, %275, %279 in 0 : vector<4x8xf32>, vector<4x8xf32>, vector<4x8xf32>, vector<4x8xf32>, vector<4x8xf32>, vector<4x8xf32>, vector<4x8xf32>, vector<4x8xf32> -> vector<32x8xf32>
    %c0_82 = arith.constant 0 : index
    %c0_83 = arith.constant 0 : index
    %281 = vector.load %arg13[%c0_82, %c0_83] : memref<8x8xf32, #tpu.memory_space<vmem>>, vector<8x8xf32>
    %cst_84 = arith.constant dense<0.000000e+00> : vector<32x8xf32>
    %282 = tpu.matmul %280, %281, %cst_84 {dimension_numbers = #tpu.dot_dimension_numbers<[1], [0], [0], [1], [0, 0, 1, 1], [], []>} : vector<32x8xf32>, vector<8x8xf32>, vector<32x8xf32> -> vector<32x8xf32>
    %c0_85 = arith.constant 0 : index
    %c0_86 = arith.constant 0 : index
    %283 = vector.load %arg17[%c0_85, %c0_86] : memref<32x8xf32, #tpu.memory_space<vmem>>, vector<32x8xf32>
    tpu.vector_store %arg17[%c0_85, %c0_86], %282 {strides = array<i32>} : memref<32x8xf32, #tpu.memory_space<vmem>>, vector<32x8xf32>,
    %c0_87 = arith.constant 0 : index
    %c0_88 = arith.constant 0 : index
    %284 = vector.load %arg14[%c0_87, %c0_88] : memref<8x4xf32, #tpu.memory_space<vmem>>, vector<8x4xf32>
    %cst_89 = arith.constant dense<0.000000e+00> : vector<32x4xf32>
    %285 = tpu.matmul %282, %284, %cst_89 {dimension_numbers = #tpu.dot_dimension_numbers<[1], [0], [0], [1], [0, 0, 1, 1], [], []>} : vector<32x8xf32>, vector<8x4xf32>, vector<32x4xf32> -> vector<32x4xf32>
    %c0_90 = arith.constant 0 : index
    %c0_91 = arith.constant 0 : index
    %286 = vector.load %arg16[%c0_90, %c0_91] : memref<32x4xf32, #tpu.memory_space<vmem>>, vector<32x4xf32>
    tpu.vector_store %arg16[%c0_90, %c0_91], %285 {strides = array<i32>} : memref<32x4xf32, #tpu.memory_space<vmem>>, vector<32x4xf32>,
    return
  }
}

</mosaic_0001>

<bundles_post_ra>
// kernel: tpu_custom_call.1
= control target key start
LH: loop header
LB: loop body
LE: loop exit
PB: predicated region body
PF: predicated region fallthrough
CT: control target
= control target key end

     0   :  { %s3494_s0 = inlined_call_operand.vmem [shape: f32[32,8], index: 0, kind: input, shape index: {}]   ;;  %s3495_s1 = inlined_call_operand.hbm [shape: f32[2,4,32], index: 1, kind: input, shape index: {}]   ;;  %s3496_s2 = inlined_call_operand.hbm [shape: f32[2,4,32], index: 2, kind: input, shape index: {}]   ;;  %s3497_s3 = inlined_call_operand.hbm [shape: f32[8,256], index: 3, kind: input, shape index: {}]   ;;  %s3498_s4 = inlined_call_operand.hbm [shape: f32[1,256], index: 4, kind: input, shape index: {}]   ;;  %s3499_s5 = inlined_call_operand.vmem [shape: f32[64,256], index: 5, kind: input, shape index: {}]   ;;  %s3500_s6 = inlined_call_operand.vmem [shape: f32[32,8], index: 6, kind: input, shape index: {}]   ;;  %s3501_s7 = inlined_call_operand.hbm [shape: f32[1,8], index: 7, kind: input, shape index: {}]   ;;  %s3502_s8 = inlined_call_operand.vmem [shape: f32[32,64], index: 8, kind: input, shape index: {}]   ;;  %s3503_s9 = inlined_call_operand.vmem [shape: f32[1,64], index: 9, kind: input, shape index: {}]   ;;  %s3504_s10 = inlined_call_operand.hbm [shape: f32[8,64], index: 10, kind: input, shape index: {}]   ;;  %s3505_s11 = inlined_call_operand.hbm [shape: f32[8,64], index: 11, kind: input, shape index: {}]   ;;  %s3506_s12 = inlined_call_operand.vmem [shape: f32[64,8], index: 12, kind: input, shape index: {}]   ;;  %s3507_s13 = inlined_call_operand.vmem [shape: f32[8,8], index: 13, kind: input, shape index: {}]   ;;  %s3508_s14 = inlined_call_operand.vmem [shape: f32[8,4], index: 14, kind: input, shape index: {}]   ;;  %s3509_s15 = inlined_call_operand.hbm [shape: f32[4,8], index: 15, kind: input, shape index: {}]   ;;  %s3510_s16 = inlined_call_operand.vmem [shape: f32[32,4], index: 16, kind: output, shape index: {0}]   ;;  %s3511_s17 = inlined_call_operand.vmem [shape: f32[32,8], index: 17, kind: output, shape index: {1}]   ;;  %s3512_s18 = inlined_call_operand.hbm [shape: f32[32,128], index: 18, kind: output, shape index: {2}]   ;;  %s3513_s19 = inlined_call_operand.hbm [shape: f32[2,4,32], index: 19, kind: output, shape index: {3}]   ;;  %s3514_s20 = inlined_call_operand.hbm [shape: f32[2,4,32], index: 20, kind: output, shape index: {4}]  }
   0x1   :  { %3517 = sst [smem:[#allocation28_spill]] %s3494_s0 }
   0x2   :  { %3518 = sst [smem:[#allocation29_spill]] %s3495_s1 }
   0x3   :  { %3519 = sst [smem:[#allocation30_spill]] %s3496_s2 }
   0x4   :  { %3520 = sst [smem:[#allocation31_spill]] %s3497_s3 }
   0x5   :  { %3521 = sst [smem:[#allocation32_spill]] %s3498_s4 }
   0x6   :  { %3522 = sst [smem:[#allocation33_spill]] %s3510_s16 }
   0x7   :  { %26 = vsyncpa [#allocation4], 0 }
   0x8   :  { %27 = vsyncpa [#allocation7], 0 }
   0x9   :  { %28 = vsyncpa [#allocation10], 0 }
   0xa   :  { %29 = vsyncpa [#allocation13], 0 }
   0xb   :  { %30 = vsyncpa [#allocation16], 0 }
   0xc   :  { %31 = vsyncpa [#allocation5], 0 }
   0xd   :  { %32 = vsyncpa [#allocation19], 0  ;;  %s2781_s1 = smov [#allocation6]   ;;  %s2782_s23 = smov [#allocation9]  }
   0xe   :  { %s52_s22 = sshll.u32 %s2781_s1, 4  ;;  %s75_s24 = sshll.u32 %s2782_s23, 4  ;;  %s53_s22 = int_to_ptr.vmem [resolvable:$true] %s52_s22  ;;  %s76_s24 = int_to_ptr.vmem [resolvable:$true] %s75_s24 }
   0xf   :  { %s2555_s2 = scalar_lea.vmem %s53_s22, 128  ;;  %p2560_p1 = scmp.lt.s32.totalorder %s53_s22, %s53_s22 }
  0x10   :  { %p2556_p0 = scmp.ne.s32.totalorder %s53_s22, %s2555_s2  ;;  %p2561_p2 = scmp.lt.s32.totalorder %s2555_s2, %s2555_s2 }
  0x12   :  { %p2562_p3 = por %p2561_p2, %p2560_p1 }
  0x14   :  { %p2563_p4 = pnand %p2562_p3, %p2556_p0 }
  0x16   :  { %2566 = shalt.err (!%p2563_p4)
}
  0x17   :  { %s2783_s25 = smov 64   ;;  %s2784_s3 = smov 4  }
  0x18   :  { %s3523_s28 = sld [smem:[#allocation30_spill]]  ;;  %s2575_s4 = scalar_lea.vmem %s76_s24, 32 }
  0x19   :  { %p2576_p5 = scmp.ne.s32.totalorder %s76_s24, %s2575_s4  ;;  %p2580_p6 = scmp.lt.s32.totalorder %s76_s24, %s76_s24 }
  0x1a   :  { %p2581_p7 = scmp.lt.s32.totalorder %s2575_s4, %s2575_s4 }
  0x1c   :  { %p2582_p8 = por %p2581_p7, %p2580_p6 }
  0x1e   :  { %58 = dma.hbm_to_vmem [thread:$0]  %s3523_s28, 128, %s53_s22, [#allocation7], %s2783_s25, %s2783_s25, %s2784_s3  }
  0x1f   :  { %p2583_p9 = pnand %p2582_p8, %p2576_p5 }
  0x21   :  { %2586 = shalt.err (!%p2583_p9)
}
  0x22   :  { %s3524_s0 = sld [smem:[#allocation32_spill]]  ;;  %s2785_s21 = smov [#allocation12]  }
  0x23   :  { %s103_s1 = sshll.u32 %s2785_s21, 4  ;;  %s2786_s23 = smov [#allocation3]   ;;  %s104_s1 = int_to_ptr.vmem [resolvable:$true] %s103_s1 }
  0x24   :  { %s40_s2 = sshll.u32 %s2786_s23, 4  ;;  %s2595_s16 = scalar_lea.vmem %s104_s1, 128  ;;  %s41_s2 = int_to_ptr.vmem [resolvable:$true] %s40_s2 }
  0x25   :  { %p2596_p10 = scmp.ne.s32.totalorder %s104_s1, %s2595_s16  ;;  %p2600_p11 = scmp.lt.s32.totalorder %s104_s1, %s104_s1 }
  0x26   :  { %p2601_p12 = scmp.lt.s32.totalorder %s2595_s16, %s2595_s16 }
  0x28   :  { %78 = dma.hbm_to_vmem [thread:$0]  %s3524_s0, 32, %s76_s24, [#allocation10]  }
  0x29   :  { %p2602_p13 = por %p2601_p12, %p2600_p11 }
  0x2b   :  { %p2603_p0 = pnand %p2602_p13, %p2596_p10 }
  0x2d   :  { %2606 = shalt.err (!%p2603_p0)
}
  0x2e   :  { %106 = dma.hbm_to_vmem [thread:$0]  %s3504_s10, 128, %s104_s1, [#allocation13]  }
  0x2f   :  { %s2615_s27 = scalar_lea.vmem %s41_s2, 128  ;;  %p2620_p2 = scmp.lt.s32.totalorder %s41_s2, %s41_s2 }
  0x30   :  { %p2616_p1 = scmp.ne.s32.totalorder %s41_s2, %s2615_s27  ;;  %p2621_p3 = scmp.lt.s32.totalorder %s2615_s27, %s2615_s27 }
  0x32   :  { %p2622_p4 = por %p2621_p3, %p2620_p2 }
  0x34   :  { %p2623_p5 = pnand %p2622_p4, %p2616_p1 }
  0x36   :  { %2626 = shalt.err (!%p2623_p5)
}
  0x37   :  { %s3525_s16 = sld [smem:[#allocation29_spill]]  ;;  %s2787_s4 = smov [#allocation8]  }
  0x38   :  { %s65_s29 = sshll.u32 %s2787_s4, 4  ;;  %s2788_s30 = smov [#allocation11]   ;;  %s66_s29 = int_to_ptr.vmem [resolvable:$true] %s65_s29 }
  0x39   :  { %s89_s0 = sshll.u32 %s2788_s30, 4  ;;  %s2635_s10 = scalar_lea.vmem %s66_s29, 256  ;;  %s90_s0 = int_to_ptr.vmem [resolvable:$true] %s89_s0 }
  0x3a   :  { %p2636_p6 = scmp.ne.s32.totalorder %s66_s29, %s2635_s10  ;;  %p2640_p7 = scmp.lt.s32.totalorder %s66_s29, %s66_s29 }
  0x3b   :  { %p2641_p8 = scmp.lt.s32.totalorder %s2635_s10, %s2635_s10 }
  0x3d   :  { %46 = dma.hbm_to_vmem [thread:$0]  %s3525_s16, 128, %s41_s2, [#allocation4], %s2783_s25, %s2783_s25, %s2784_s3  }
  0x3e   :  { %p2642_p9 = por %p2641_p8, %p2640_p7 }
  0x40   :  { %p2643_p10 = pnand %p2642_p9, %p2636_p6 }
  0x42   :  { %2646 = shalt.err (!%p2643_p10)
}
  0x43   :  { %s3526_s23 = sld [smem:[#allocation31_spill]]  ;;  %s2655_s22 = scalar_lea.vmem %s90_s0, 16 }
  0x44   :  { %p2656_p11 = scmp.ne.s32.totalorder %s90_s0, %s2655_s22  ;;  %s2659_s2 = scalar_lea.vmem %s90_s0, 32 }
  0x45   :  { %p2660_p12 = scmp.lt.s32.totalorder %s90_s0, %s90_s0  ;;  %p2661_p13 = scmp.lt.s32.totalorder %s2659_s2, %s2655_s22 }
  0x47   :  { %p2662_p0 = por %p2661_p13, %p2660_p12 }
  0x49   :  { %68 = dma.hbm_to_vmem [thread:$0]  %s3526_s23, 256, %s66_s29, [#allocation7]  }
  0x4a   :  { %p2663_p1 = pnand %p2662_p0, %p2656_p11 }
  0x4c   :  { %2666 = shalt.err (!%p2663_p1)
}
  0x4d   :  { %92 = dma.hbm_to_vmem [thread:$0]  %s3501_s7, 16, %s90_s0, [#allocation10]  }
  0x4e   :  { %s2789_s24 = smov [#allocation14]   ;;  %s2790_s16 = smov [#allocation15]  }
  0x4f   :  { %s113_s28 = sshll.u32 %s2789_s24, 4  ;;  %s129_s4 = sshll.u32 %s2790_s16, 4  ;;  %s114_s28 = int_to_ptr.vmem [resolvable:$true] %s113_s28  ;;  %s130_s4 = int_to_ptr.vmem [resolvable:$true] %s129_s4 }
  0x50   :  { %s2675_s30 = scalar_lea.vmem %s114_s28, 128  ;;  %p2680_p3 = scmp.lt.s32.totalorder %s114_s28, %s114_s28 }
  0x51   :  { %p2676_p2 = scmp.ne.s32.totalorder %s114_s28, %s2675_s30  ;;  %p2681_p4 = scmp.lt.s32.totalorder %s2675_s30, %s2675_s30 }
  0x53   :  { %p2682_p5 = por %p2681_p4, %p2680_p3 }
  0x55   :  { %p2683_p6 = pnand %p2682_p5, %p2676_p2 }
  0x57   :  { %2686 = shalt.err (!%p2683_p6)
}
  0x58   :  { %116 = dma.hbm_to_vmem [thread:$0]  %s3505_s11, 128, %s114_s28, [#allocation13]  }
  0x59   :  { %s2695_s21 = scalar_lea.vmem %s130_s4, 64  ;;  %p2700_p8 = scmp.lt.s32.totalorder %s130_s4, %s130_s4 }
  0x5a   :  { %p2696_p7 = scmp.ne.s32.totalorder %s130_s4, %s2695_s21  ;;  %p2701_p9 = scmp.lt.s32.totalorder %s2695_s21, %s2695_s21 }
  0x5c   :  { %p2702_p10 = por %p2701_p9, %p2700_p8 }
  0x5e   :  { %p2703_p11 = pnand %p2702_p10, %p2696_p7 }
  0x60   :  { %2706 = shalt.err (!%p2703_p11)
}
  0x61   :  { %132 = dma.hbm_to_vmem [thread:$0]  %s3509_s15, 64, %s130_s4, [#allocation16]  }
  0x62   :  { %2767 = dma.done.wait [#allocation4], 128  }
  0x63   :  { %2768 = vsyncadd [#allocation4], 4294967168 }
  0x64   :  { %2769 = dma.done.wait [#allocation7], 384  }
  0x65   :  { %2770 = vsyncadd [#allocation7], 4294966912 }
  0x66   :  { %2771 = dma.done.wait [#allocation10], 48  }
  0x67   :  { %2772 = vsyncadd [#allocation10], 4294967248 }
  0x68   :  { %2773 = dma.done.wait [#allocation13], 256  }
  0x69   :  { %2774 = vsyncadd [#allocation13], 4294967040 }
  0x6a   :  { %2775 = dma.done.wait [#allocation16], 64  }
  0x6b   :  { %2776 = vsyncadd [#allocation16], 4294967232  ;;  %v2791_v0 = vmov 0.0   ;;  %v295_v1 = vld [vmem:[#allocation3 + $0x4] sm:$0xf]  ;;  %v178_v2 = vld [vmem:[#allocation8 + $0x8] sm:$0xff]  ;;  %v181_v28 = vlaneseq }
  0x6c   :  { %268 = vmatprep.mubr.f32.mxu1 %v2791_v0  ;;  %494 = vmatprep.mubr.f32.mxu0 %v2791_v0  ;;  %v177_v3 = vld [vmem:[#allocation8] sm:$0xff]  ;;  %vm191_vm0 = vcmask 64512   ;;  %s2792_s11 = smov 32   ;;  %s3527_s23 = sld [smem:[#allocation28_spill]]  ;;  %v2943_v5 = vld [vmem:[%s3499_s5 + $0x78] sm:$0xff]  ;;  %v2953_v7 = vld [vmem:[%s3499_s5 + $0x68] sm:$0xff] }
  0x6d   :  { %297 = vrot.lane.b32.xlu0 %v295_v1, %s2792_s11  ;;  %234 = vmatprep.subr.mxu1 %v178_v2  ;;  %v2948_v6 = vld [vmem:[%s3499_s5 + $0x70] sm:$0xff]  ;;  %v2961_v8 = vld [vmem:[%s3499_s5 + $0x60] sm:$0xff]  ;;  %v2971_v10 = vld [vmem:[%s3499_s5 + $0x58] sm:$0xff]  ;;  %vm300_vm1 = vcmask 261120   ;;  %vm310_vm2 = vcmask 523264   ;;  %v182_v29 = vshrl.u32 %v181_v28, 7 }
  0x6e   :  { %235 = vmatpush1.msra.mxu1 %v177_v3  ;;  %446 = vmatprep.subr.mxu0 %v2943_v5  ;;  %v2977_v11 = vld [vmem:[%s3499_s5 + $0x50] sm:$0xff]  ;;  %v2984_v12 = vld [vmem:[%s3499_s5 + $0x48] sm:$0xff]  ;;  %v2992_v13 = vld [vmem:[%s3499_s5 + $0x40] sm:$0xff]  ;;  %vm548_vm3 = vcmask 261124   ;;  %vm663_vm4 = vcmask 257024   ;;  %vm1948_vm5 = vcmask 1043456  }
  0x6f   :  { %330 = vmatprep.subr.mxu1 %v2943_v5  ;;  %447 = vmatpush1.msra.mxu0 %v2948_v6  ;;  %v3002_v15 = vld [vmem:[%s3499_s5 + $0x38] sm:$0xff]  ;;  %v304_v16 = vld [vmem:[#allocation6 + $0x4] sm:$0xf]  ;;  %v3008_v17 = vld [vmem:[%s3499_s5 + $0x30] sm:$0xff]  ;;  %v183_v30 = vsub.s32 0, %v182_v29  ;;  %v187_v35 = vsub.s32 1, %v182_v29 }
  0x70   :  { %448 = vmatprep.subr.mxu0 %v2953_v7  ;;  %v3015_v18 = vld [vmem:[%s3499_s5 + $0x28] sm:$0xff]  ;;  %v3023_v19 = vld [vmem:[%s3499_s5 + $0x20] sm:$0xff]  ;;  %v3033_v21 = vld [vmem:[%s3499_s5 + $0x18] sm:$0xff]  ;;  %s2794_s15 = smov [#allocation18]   ;;  %s2795_s22 = smov [#allocation17]  }
  0x71   :  { %306 = vrot.lane.b32.xlu0 %v304_v16, %s2792_s11  ;;  %449 = vmatpush1.msra.mxu0 %v2961_v8  ;;  %v3039_v22 = vld [vmem:[%s3499_s5 + $0x10] sm:$0xff]  ;;  %v3046_v23 = vld [vmem:[%s3499_s5 + $0x8] sm:$0xff]  ;;  %v3054_v24 = vld [vmem:[%s3499_s5] sm:$0xff]  ;;  %s2793_s5 = smov 96   ;;  %s2179_s1 = sshll.u32 %s2794_s15, 4  ;;  %s2180_s1 = int_to_ptr.vmem [resolvable:$true] %s2179_s1 }
  0x72   :  { %v157_v4 = vld [vmem:[%s3527_s23] sm:$0xff]  ;;  %v158_v9 = vld [vmem:[%s3527_s23 + $0x8] sm:$0xff]  ;;  %v159_v14 = vld [vmem:[%s3527_s23 + $0x10] sm:$0xff]  ;;  %450 = vmatprep.subr.mxu0 %v2971_v10  ;;  %s2167_s2 = sshll.u32 %s2795_s22, 4  ;;  %s2707_s26 = scalar_lea.vmem %s2180_s1, 128  ;;  %s2168_s2 = int_to_ptr.vmem [resolvable:$true] %s2167_s2 }
  0x73   :  { %2218 = vmatmul.mubr.msk.f32.vlgmr.msra.gmra.mxu1 %vm191_vm0, %v157_v4  ;;  %v160_v20 = vld [vmem:[%s3527_s23 + $0x18] sm:$0xff]  ;;  %451 = vmatpush1.msra.mxu0 %v2977_v11  ;;  %v293_v25 = vld [vmem:[#allocation3] sm:$0xf]  ;;  %v302_v54 = vld [vmem:[#allocation6] sm:$0xf]  ;;  %p2708_p12 = scmp.ne.s32.totalorder %s2180_s1, %s2707_s26  ;;  %p2712_p13 = scmp.lt.s32.totalorder %s2180_s1, %s2180_s1 }
  0x74   :  { %331 = vmatpush1.msra.mxu1 %v2948_v6  ;;  %274 = vmatprep.mubr.f32.mxu1 %v2791_v0  ;;  %v179_v31 = vld [vmem:[#allocation9] sm:$0x3]  ;;  %p2713_p0 = scmp.lt.s32.totalorder %s2707_s26, %s2707_s26 }
  0x75   :  { %332 = vmatprep.subr.mxu1 %v2953_v7  ;;  %452 = vmatprep.subr.mxu0 %v2984_v12  ;;  %v184_v32 = vrot.slane %v179_v31, %v183_v30  ;;  %v3096_v38 = vrot.slane %v179_v31, %v187_v35 }
  0x76   :  { %333 = vmatpush1.msra.mxu1 %v2961_v8  ;;  %453 = vmatpush1.msra.mxu0 %v2992_v13  ;;  %p2714_p1 = por %p2713_p0, %p2712_p13 }
  0x77   :  { %2219 = vmatmul.mubr.msk.f32.gmra.mxu1 %vm191_vm0, %v158_v9  ;;  %334 = vmatprep.subr.mxu1 %v2971_v10 }
  0x78   :  { %335 = vmatpush1.msra.mxu1 %v2977_v11  ;;  %280 = vmatprep.mubr.f32.mxu1 %v2791_v0  ;;  %p2715_p2 = pnand %p2714_p1, %p2708_p12 }
  0x79   :  { %336 = vmatprep.subr.mxu1 %v2984_v12  ;;  %454 = vmatprep.subr.mxu0 %v3002_v15 }
  0x7a   :  { %337 = vmatpush1.msra.mxu1 %v2992_v13  ;;  %455 = vmatpush1.msra.mxu0 %v3008_v17 }
  0x7b   :  { %2220 = vmatmul.mubr.msk.f32.gmra.mxu1 %vm191_vm0, %v159_v14  ;;  %338 = vmatprep.subr.mxu1 %v3002_v15 }
  0x7c   :  { %339 = vmatpush1.msra.mxu1 %v3008_v17  ;;  %286 = vmatprep.mubr.f32.mxu1 %v2791_v0 }
  0x7d   :  { %340 = vmatprep.subr.mxu1 %v3015_v18  ;;  %456 = vmatprep.subr.mxu0 %v3015_v18 }
  0x7e   :  { %341 = vmatpush1.msra.mxu1 %v3023_v19  ;;  %457 = vmatpush1.msra.mxu0 %v3023_v19 }
  0x7f   :  { %2221 = vmatmul.mubr.msk.f32.gmra.mxu1 %vm191_vm0, %v160_v20  ;;  %342 = vmatprep.subr.mxu1 %v3033_v21 }
  0x80   :  { %343 = vmatpush1.msra.mxu1 %v3039_v22  ;;  %378 = vmatprep.mubr.f32.mxu1 %v2791_v0 }
  0x81   :  { %344 = vmatprep.subr.mxu1 %v3046_v23  ;;  %458 = vmatprep.subr.mxu0 %v3033_v21 }
  0x82   :  { %345 = vmatpush1.msra.mxu1 %v3054_v24  ;;  %459 = vmatpush1.msra.mxu0 %v3039_v22 }
  0x83   :  { %569 = vmatprep.subr.mxu1 %v2943_v5  ;;  %460 = vmatprep.subr.mxu0 %v3046_v23 }
  0x84   :  { %461 = vmatpush1.msra.mxu0 %v3054_v24 }
  0x85   :  { %683 = vmatprep.subr.mxu0 %v2943_v5 }
  0xdf   :  { %v298_v26 = vpop.permute.xlu0 %297 }
  0xe0   :  { %v3073_v27 = vsel %vm300_vm1, %v293_v25, %v298_v26 }
  0xe1   :  { %2222 = vmatmul.mubr.msk.f32.vlgmr.msra.gmra.mxu1 %vm310_vm2, %v3073_v27 }
  0xe2   :  { %570 = vmatpush1.msra.mxu1 %v2948_v6  ;;  %617 = vmatprep.mubr.f32.mxu1 %v2791_v0 }
  0xe3   :  { %571 = vmatprep.subr.mxu1 %v2953_v7  ;;  %v307_v53 = vpop.permute.xlu0 %306 }
  0xe4   :  { %572 = vmatpush1.msra.mxu1 %v2961_v8  ;;  %v309_v56 = vsel %vm300_vm1, %v302_v54, %v307_v53 }
  0xe5   :  { %573 = vmatprep.subr.mxu1 %v2971_v10 }
  0xe6   :  { %574 = vmatpush1.msra.mxu1 %v2977_v11 }
  0xe7   :  { %575 = vmatprep.subr.mxu1 %v2984_v12 }
  0xe8   :  { %576 = vmatpush1.msra.mxu1 %v2992_v13 }
  0xe9   :  { %577 = vmatprep.subr.mxu1 %v3002_v15 }
  0xea   :  { %578 = vmatpush1.msra.mxu1 %v3008_v17 }
  0xeb   :  { %579 = vmatprep.subr.mxu1 %v3015_v18 }
  0xec   :  { %580 = vmatpush1.msra.mxu1 %v3023_v19 }
  0xed   :  { %581 = vmatprep.subr.mxu1 %v3033_v21 }
  0xee   :  { %582 = vmatpush1.msra.mxu1 %v3039_v22 }
  0xef   :  { %583 = vmatprep.subr.mxu1 %v3046_v23 }
  0xf0   :  { %584 = vmatpush1.msra.mxu1 %v3054_v24 }
  0xf1   :  { %803 = vmatprep.subr.mxu1 %v2943_v5 }
 0x133   :  { %v270_v33 = vpop.f32.mrf.mxu1 }
 0x134   :  { %v3094_v34 = vadd.f32 %v270_v33, %v184_v32 }
 0x135   :  { %v272_v36 = vpop.f32.mrf.mxu1 }
 0x136   :  { %v273_v50 = vadd.f32 %v272_v36, %v3096_v38 }
 0x137   :  { %v276_v37 = vpop.f32.mrf.mxu1 }
 0x138   :  { %v3098_v39 = vadd.f32 %v276_v37, %v184_v32 }
 0x139   :  { %v278_v40 = vpop.f32.mrf.mxu1 }
 0x13a   :  { %v3101_v41 = vadd.f32 %v278_v40, %v3096_v38 }
 0x13b   :  { %v282_v42 = vpop.f32.mrf.mxu1 }
 0x13c   :  { %v3103_v43 = vadd.f32 %v282_v42, %v184_v32 }
 0x13d   :  { %v284_v44 = vpop.f32.mrf.mxu1 }
 0x13e   :  { %v3106_v45 = vadd.f32 %v284_v44, %v3096_v38 }
 0x13f   :  { %v288_v46 = vpop.f32.mrf.mxu1 }
 0x140   :  { %v3108_v47 = vadd.f32 %v288_v46, %v184_v32 }
 0x141   :  { %v3110_v48 = vpop.f32.mrf.mxu1 }
 0x1a1   :  { %v380_v49 = vpop.f32.mrf.mxu1 }
 0x1a2   :  { %v385_v57 = vadd.f32 %v380_v49, %v3094_v34 }
 0x1a3   :  { %v382_v51 = vpop.f32.mrf.mxu1 }
 0x1a4   :  { %v386_v52 = vadd.f32 %v382_v51, %v273_v50  ;;  %v2223_v58 = vmul.f32 -1.442695, %v385_v57 }
 0x1a6   :  { %2427 = vtanh.f32 %v386_v52  ;;  %v2224_v14 = vmul.f32 -1.442695, %v386_v52 }
 0x1a7   :  { %2429 = vpow2.f32 %v2223_v58 }
 0x1b3   :  { %v2428_v55 = vpop.eup %2427 }
 0x1b4   :  { %406 = vrot.lane.b32.xlu1 %v2428_v55, %s2783_s25  ;;  %v2430_v59 = vpop.eup %2429 }
 0x1b5   :  { %v393_v60 = vadd.f32 1.0, %v2430_v59 }
 0x1b7   :  { %2431 = vrcp.f32 %v393_v60 }
 0x1b8   :  { %401 = vrot.lane.b32.xlu1 %v309_v56, %s2783_s25 }
 0x1c4   :  { %v2432_v61 = vpop.eup %2431 }
 0x226   :  { %v407_v62 = vpop.permute.xlu1 %406 }
 0x227   :  { %v409_v63 = vmul.f32 %v2432_v61, %v407_v62 }
 0x229   :  { %411 = vrot.lane.b32.xlu0 %v409_v63, %s2783_s25 }
 0x22a   :  { %v402_v1 = vpop.permute.xlu1 %401 }
 0x22b   :  { %v404_v2 = vmul.f32 %v2432_v61, %v402_v1 }
 0x29b   :  { %v412_v3 = vpop.permute.xlu0 %411 }
 0x29c   :  { %v414_v4 = vadd.f32 %v412_v3, %v404_v2 }
 0x29e   :  { %2433 = vtanh.f32 %v414_v4  ;;  %423 = vrot.lane.b32.xlu0 %v414_v4, %s2783_s25 }
 0x29f   :  { %2435 = vpow2.f32 %v2224_v14 }
 0x2ab   :  { %v2434_v9 = vpop.eup %2433 }
 0x2ac   :  { %417 = vrot.lane.b32.xlu1 %v2434_v9, %s2783_s25  ;;  %v2436_v16 = vpop.eup %2435 }
 0x2ad   :  { %v394_v20 = vadd.f32 1.0, %v2436_v16 }
 0x2af   :  { %2437 = vrcp.f32 %v394_v20 }
 0x2bc   :  { %v2438_v29 = vpop.eup %2437 }
 0x310   :  { %v424_v25 = vpop.permute.xlu0 %423 }
 0x311   :  { %v426_v26 = vsel %vm300_vm1, %v424_v25, %v309_v56 }
 0x312   :  { %v523_v28 = vrot.slane %v426_v26, 4 }
 0x314   :  { %524 = vrot.lane.b32.xlu0 %v523_v28, %s2783_s25 }
 0x31e   :  { %v418_v30 = vpop.permute.xlu1 %417 }
 0x31f   :  { %v420_v31 = vmul.f32 %v2438_v29, %v418_v30 }
 0x321   :  { %v421_v32 = vsel %vm300_vm1, %v420_v31, %v3073_v27 }
 0x322   :  { %2225 = vmatmul.mubr.msk.f32.vlgmr.msra.gmra.mxu0 %vm310_vm2, %v421_v32 }
 0x323   :  { %684 = vmatpush1.msra.mxu0 %v2948_v6  ;;  %731 = vmatprep.mubr.f32.mxu0 %v2791_v0 }
 0x324   :  { %685 = vmatprep.subr.mxu0 %v2953_v7 }
 0x325   :  { %686 = vmatpush1.msra.mxu0 %v2961_v8 }
 0x326   :  { %687 = vmatprep.subr.mxu0 %v2971_v10 }
 0x327   :  { %688 = vmatpush1.msra.mxu0 %v2977_v11 }
 0x328   :  { %689 = vmatprep.subr.mxu0 %v2984_v12 }
 0x329   :  { %690 = vmatpush1.msra.mxu0 %v2992_v13 }
 0x32a   :  { %691 = vmatprep.subr.mxu0 %v3002_v15 }
 0x32b   :  { %692 = vmatpush1.msra.mxu0 %v3008_v17 }
 0x32c   :  { %693 = vmatprep.subr.mxu0 %v3015_v18 }
 0x32d   :  { %694 = vmatpush1.msra.mxu0 %v3023_v19 }
 0x32e   :  { %695 = vmatprep.subr.mxu0 %v3033_v21 }
 0x32f   :  { %696 = vmatpush1.msra.mxu0 %v3039_v22 }
 0x330   :  { %697 = vmatprep.subr.mxu0 %v3046_v23 }
 0x331   :  { %698 = vmatpush1.msra.mxu0 %v3054_v24 }
 0x332   :  { %916 = vmatprep.subr.mxu0 %v2943_v5 }
 0x386   :  { %v525_v54 = vpop.permute.xlu0 %524 }
 0x3e2   :  { %v496_v27 = vpop.f32.mrf.mxu0 }
 0x3e3   :  { %v503_v40 = vrot.slane %v496_v27, 4 }
 0x3e4   :  { %v498_v33 = vpop.f32.mrf.mxu0 }
 0x3e5   :  { %v504_v35 = vrot.slane %v498_v33, 4  ;;  %v507_v42 = vadd.f32 %v503_v40, %v3094_v34 }
 0x3e7   :  { %v508_v36 = vadd.f32 %v504_v35, %v273_v50  ;;  %v2226_v44 = vmul.f32 -1.442695, %v507_v42 }
 0x3e9   :  { %2439 = vtanh.f32 %v508_v36  ;;  %v2227_v58 = vmul.f32 -1.442695, %v508_v36 }
 0x3ea   :  { %2441 = vpow2.f32 %v2226_v44 }
 0x3f6   :  { %v2440_v37 = vpop.eup %2439 }
 0x3f7   :  { %529 = vrot.lane.b32.xlu1 %v2440_v37, %s2783_s25  ;;  %v2442_v46 = vpop.eup %2441 }
 0x3f8   :  { %v515_v49 = vadd.f32 1.0, %v2442_v46 }
 0x3fa   :  { %2443 = vrcp.f32 %v515_v49 }
 0x407   :  { %v2444_v51 = vpop.eup %2443 }
 0x408   :  { %v527_v55 = vmul.f32 %v2444_v51, %v525_v54 }
 0x469   :  { %v530_v52 = vpop.permute.xlu1 %529 }
 0x46a   :  { %v532_v53 = vmul.f32 %v2444_v51, %v530_v52 }
 0x46c   :  { %534 = vrot.lane.b32.xlu1 %v532_v53, %s2783_s25 }
 0x4de   :  { %v535_v50 = vpop.permute.xlu1 %534 }
 0x4df   :  { %v537_v56 = vadd.f32 %v535_v50, %v527_v55 }
 0x4e1   :  { %2445 = vtanh.f32 %v537_v56  ;;  %v640_v29 = vrot.slane %v537_v56, 4 }
 0x4e2   :  { %2447 = vpow2.f32 %v2227_v58 }
 0x4ee   :  { %v2446_v57 = vpop.eup %2445 }
 0x4ef   :  { %540 = vrot.lane.b32.xlu0 %v2446_v57, %s2783_s25  ;;  %v2448_v34 = vpop.eup %2447 }
 0x4f0   :  { %v516_v59 = vadd.f32 1.0, %v2448_v34 }
 0x4f2   :  { %2449 = vrcp.f32 %v516_v59 }
 0x4ff   :  { %v2450_v60 = vpop.eup %2449 }
 0x561   :  { %v541_v61 = vpop.permute.xlu0 %540 }
 0x562   :  { %v3146_v62 = vmul.f32 %v2450_v60, %v541_v61 }
 0x564   :  { %v550_v63 = vrot.slane %v3146_v62, 4 }
 0x566   :  { %2228 = vmatmul.mubr.msk.f32.vlgmr.msra.gmra.mxu1 %vm310_vm2, %v550_v63 }
 0x567   :  { %804 = vmatpush1.msra.mxu1 %v2948_v6  ;;  %851 = vmatprep.mubr.f32.mxu1 %v2791_v0 }
 0x568   :  { %805 = vmatprep.subr.mxu1 %v2953_v7 }
 0x569   :  { %806 = vmatpush1.msra.mxu1 %v2961_v8 }
 0x56a   :  { %807 = vmatprep.subr.mxu1 %v2971_v10 }
 0x56b   :  { %808 = vmatpush1.msra.mxu1 %v2977_v11 }
 0x56c   :  { %809 = vmatprep.subr.mxu1 %v2984_v12 }
 0x56d   :  { %810 = vmatpush1.msra.mxu1 %v2992_v13 }
 0x56e   :  { %811 = vmatprep.subr.mxu1 %v3002_v15 }
 0x56f   :  { %812 = vmatpush1.msra.mxu1 %v3008_v17 }
 0x570   :  { %813 = vmatprep.subr.mxu1 %v3015_v18 }
 0x571   :  { %814 = vmatpush1.msra.mxu1 %v3023_v19 }
 0x572   :  { %815 = vmatprep.subr.mxu1 %v3033_v21 }
 0x573   :  { %816 = vmatpush1.msra.mxu1 %v3039_v22 }
 0x574   :  { %817 = vmatprep.subr.mxu1 %v3046_v23 }
 0x575   :  { %818 = vmatpush1.msra.mxu1 %v3054_v24 }
 0x576   :  { %1036 = vmatprep.subr.mxu1 %v2943_v5 }
 0x626   :  { %v619_v1 = vpop.f32.mrf.mxu1 }
 0x627   :  { %v624_v9 = vadd.f32 %v619_v1, %v3098_v39 }
 0x628   :  { %v621_v2 = vpop.f32.mrf.mxu1 }
 0x629   :  { %v625_v3 = vadd.f32 %v621_v2, %v3101_v41  ;;  %v2229_v14 = vmul.f32 -1.442695, %v624_v9 }
 0x62b   :  { %2451 = vtanh.f32 %v625_v3  ;;  %v2230_v33 = vmul.f32 -1.442695, %v625_v3 }
 0x62c   :  { %2453 = vpow2.f32 %v2229_v14 }
 0x638   :  { %v2452_v4 = vpop.eup %2451 }
 0x639   :  { %644 = vrot.lane.b32.xlu1 %v2452_v4, %s2783_s25  ;;  %v2454_v16 = vpop.eup %2453 }
 0x63a   :  { %v632_v20 = vadd.f32 1.0, %v2454_v16 }
 0x63c   :  { %2455 = vrcp.f32 %v632_v20 }
 0x649   :  { %v2456_v25 = vpop.eup %2455 }
 0x64a   :  { %v642_v30 = vmul.f32 %v2456_v25, %v640_v29 }
 0x6ab   :  { %v645_v26 = vpop.permute.xlu1 %644 }
 0x6ac   :  { %v647_v28 = vmul.f32 %v2456_v25, %v645_v26 }
 0x6ae   :  { %649 = vrot.lane.b32.xlu0 %v647_v28, %s2783_s25 }
 0x720   :  { %v650_v31 = vpop.permute.xlu0 %649 }
 0x721   :  { %v652_v32 = vadd.f32 %v650_v31, %v642_v30 }
 0x723   :  { %2457 = vtanh.f32 %v652_v32  ;;  %v760_v59 = vrot.slane %v652_v32, 4 }
 0x724   :  { %2459 = vpow2.f32 %v2230_v33 }
 0x730   :  { %v2458_v27 = vpop.eup %2457 }
 0x731   :  { %655 = vrot.lane.b32.xlu1 %v2458_v27, %s2783_s25  ;;  %v2460_v35 = vpop.eup %2459 }
 0x732   :  { %v633_v36 = vadd.f32 1.0, %v2460_v35 }
 0x734   :  { %2461 = vrcp.f32 %v633_v36 }
 0x741   :  { %v2462_v37 = vpop.eup %2461 }
 0x7a3   :  { %v656_v40 = vpop.permute.xlu1 %655 }
 0x7a4   :  { %v3172_v42 = vmul.f32 %v2462_v37, %v656_v40 }
 0x7a6   :  { %2231 = vmatmul.mubr.msk.f32.vlgmr.msra.gmra.mxu0 %vm310_vm2, %v3172_v42 }
 0x7a7   :  { %917 = vmatpush1.msra.mxu0 %v2948_v6  ;;  %964 = vmatprep.mubr.f32.mxu0 %v2791_v0 }
 0x7a8   :  { %918 = vmatprep.subr.mxu0 %v2953_v7 }
 0x7a9   :  { %919 = vmatpush1.msra.mxu0 %v2961_v8 }
 0x7aa   :  { %920 = vmatprep.subr.mxu0 %v2971_v10 }
 0x7ab   :  { %921 = vmatpush1.msra.mxu0 %v2977_v11 }
 0x7ac   :  { %922 = vmatprep.subr.mxu0 %v2984_v12 }
 0x7ad   :  { %923 = vmatpush1.msra.mxu0 %v2992_v13 }
 0x7ae   :  { %924 = vmatprep.subr.mxu0 %v3002_v15 }
 0x7af   :  { %925 = vmatpush1.msra.mxu0 %v3008_v17 }
 0x7b0   :  { %926 = vmatprep.subr.mxu0 %v3015_v18 }
 0x7b1   :  { %927 = vmatpush1.msra.mxu0 %v3023_v19 }
 0x7b2   :  { %928 = vmatprep.subr.mxu0 %v3033_v21 }
 0x7b3   :  { %929 = vmatpush1.msra.mxu0 %v3039_v22 }
 0x7b4   :  { %930 = vmatprep.subr.mxu0 %v3046_v23 }
 0x7b5   :  { %931 = vmatpush1.msra.mxu0 %v3054_v24 }
 0x7b6   :  { %1149 = vmatprep.subr.mxu0 %v2943_v5 }
 0x866   :  { %v733_v44 = vpop.f32.mrf.mxu0 }
 0x867   :  { %v740_v53 = vrot.slane %v733_v44, 4 }
 0x868   :  { %v735_v46 = vpop.f32.mrf.mxu0 }
 0x869   :  { %v741_v49 = vrot.slane %v735_v46, 4  ;;  %v744_v54 = vadd.f32 %v740_v53, %v3098_v39 }
 0x86b   :  { %v745_v51 = vadd.f32 %v741_v49, %v3101_v41  ;;  %v2232_v55 = vmul.f32 -1.442695, %v744_v54 }
 0x86d   :  { %2463 = vtanh.f32 %v745_v51  ;;  %v2233_v1 = vmul.f32 -1.442695, %v745_v51 }
 0x86e   :  { %2465 = vpow2.f32 %v2232_v55 }
 0x87a   :  { %v2464_v52 = vpop.eup %2463 }
 0x87b   :  { %764 = vrot.lane.b32.xlu0 %v2464_v52, %s2783_s25  ;;  %v2466_v50 = vpop.eup %2465 }
 0x87c   :  { %v752_v56 = vadd.f32 1.0, %v2466_v50 }
 0x87e   :  { %2467 = vrcp.f32 %v752_v56 }
 0x88b   :  { %v2468_v57 = vpop.eup %2467 }
 0x88c   :  { %v762_v60 = vmul.f32 %v2468_v57, %v760_v59 }
 0x8ed   :  { %v765_v58 = vpop.permute.xlu0 %764 }
 0x8ee   :  { %v767_v34 = vmul.f32 %v2468_v57, %v765_v58 }
 0x8f0   :  { %769 = vrot.lane.b32.xlu1 %v767_v34, %s2783_s25 }
 0x962   :  { %v770_v41 = vpop.permute.xlu1 %769 }
 0x963   :  { %v772_v61 = vadd.f32 %v770_v41, %v762_v60 }
 0x965   :  { %2469 = vtanh.f32 %v772_v61 }
 0x966   :  { %2471 = vpow2.f32 %v2233_v1 }
 0x972   :  { %v2470_v63 = vpop.eup %2469 }
 0x973   :  { %775 = vrot.lane.b32.xlu0 %v2470_v63, %s2783_s25  ;;  %v2472_v39 = vpop.eup %2471 }
 0x974   :  { %v753_v2 = vadd.f32 1.0, %v2472_v39 }
 0x976   :  { %2473 = vrcp.f32 %v753_v2 }
 0x983   :  { %v2474_v3 = vpop.eup %2473 }
 0x9e5   :  { %v776_v4 = vpop.permute.xlu0 %775 }
 0x9e6   :  { %v3198_v9 = vmul.f32 %v2474_v3, %v776_v4 }
 0x9e8   :  { %v784_v14 = vrot.slane %v3198_v9, 4 }
 0x9ea   :  { %2234 = vmatmul.mubr.msk.f32.vlgmr.msra.gmra.mxu1 %vm310_vm2, %v784_v14 }
 0x9eb   :  { %1037 = vmatpush1.msra.mxu1 %v2948_v6  ;;  %1084 = vmatprep.mubr.f32.mxu1 %v2791_v0 }
 0x9ec   :  { %1038 = vmatprep.subr.mxu1 %v2953_v7 }
 0x9ed   :  { %1039 = vmatpush1.msra.mxu1 %v2961_v8 }
 0x9ee   :  { %1040 = vmatprep.subr.mxu1 %v2971_v10 }
 0x9ef   :  { %1041 = vmatpush1.msra.mxu1 %v2977_v11 }
 0x9f0   :  { %1042 = vmatprep.subr.mxu1 %v2984_v12 }
 0x9f1   :  { %1043 = vmatpush1.msra.mxu1 %v2992_v13 }
 0x9f2   :  { %1044 = vmatprep.subr.mxu1 %v3002_v15 }
 0x9f3   :  { %1045 = vmatpush1.msra.mxu1 %v3008_v17 }
 0x9f4   :  { %1046 = vmatprep.subr.mxu1 %v3015_v18 }
 0x9f5   :  { %1047 = vmatpush1.msra.mxu1 %v3023_v19 }
 0x9f6   :  { %1048 = vmatprep.subr.mxu1 %v3033_v21 }
 0x9f7   :  { %1049 = vmatpush1.msra.mxu1 %v3039_v22 }
 0x9f8   :  { %1050 = vmatprep.subr.mxu1 %v3046_v23 }
 0x9f9   :  { %1051 = vmatpush1.msra.mxu1 %v3054_v24 }
 0x9fa   :  { %1275 = vmatprep.subr.mxu1 %v2943_v5  ;;  %v874_v5 = vrot.slane %v772_v61, 4 }
 0xaaa   :  { %v853_v16 = vpop.f32.mrf.mxu1 }
 0xaab   :  { %v858_v28 = vadd.f32 %v853_v16, %v3103_v43 }
 0xaac   :  { %v855_v20 = vpop.f32.mrf.mxu1 }
 0xaad   :  { %v859_v25 = vadd.f32 %v855_v20, %v3106_v45  ;;  %v2235_v29 = vmul.f32 -1.442695, %v858_v28 }
 0xaaf   :  { %2475 = vtanh.f32 %v859_v25  ;;  %v2236_v44 = vmul.f32 -1.442695, %v859_v25 }
 0xab0   :  { %2477 = vpow2.f32 %v2235_v29 }
 0xabc   :  { %v2476_v26 = vpop.eup %2475 }
 0xabd   :  { %878 = vrot.lane.b32.xlu1 %v2476_v26, %s2783_s25  ;;  %v2478_v30 = vpop.eup %2477 }
 0xabe   :  { %v866_v31 = vadd.f32 1.0, %v2478_v30 }
 0xac0   :  { %2479 = vrcp.f32 %v866_v31 }
 0xacd   :  { %v2480_v32 = vpop.eup %2479 }
 0xace   :  { %v876_v35 = vmul.f32 %v2480_v32, %v874_v5 }
 0xb2f   :  { %v879_v27 = vpop.permute.xlu1 %878 }
 0xb30   :  { %v881_v33 = vmul.f32 %v2480_v32, %v879_v27 }
 0xb32   :  { %883 = vrot.lane.b32.xlu0 %v881_v33, %s2783_s25 }
 0xba4   :  { %v884_v36 = vpop.permute.xlu0 %883 }
 0xba5   :  { %v886_v37 = vadd.f32 %v884_v36, %v876_v35 }
 0xba7   :  { %2481 = vtanh.f32 %v886_v37  ;;  %v993_v39 = vrot.slane %v886_v37, 4 }
 0xba8   :  { %2483 = vpow2.f32 %v2236_v44 }
 0xbb4   :  { %v2482_v40 = vpop.eup %2481 }
 0xbb5   :  { %889 = vrot.lane.b32.xlu1 %v2482_v40, %s2783_s25  ;;  %v2484_v46 = vpop.eup %2483 }
 0xbb6   :  { %v867_v49 = vadd.f32 1.0, %v2484_v46 }
 0xbb8   :  { %2485 = vrcp.f32 %v867_v49 }
 0xbc5   :  { %v2486_v51 = vpop.eup %2485 }
 0xc27   :  { %v890_v52 = vpop.permute.xlu1 %889 }
 0xc28   :  { %v3224_v53 = vmul.f32 %v2486_v51, %v890_v52 }
 0xc2a   :  { %2237 = vmatmul.mubr.msk.f32.vlgmr.msra.gmra.mxu0 %vm310_vm2, %v3224_v53 }
 0xc2b   :  { %1150 = vmatpush1.msra.mxu0 %v2948_v6  ;;  %1197 = vmatprep.mubr.f32.mxu0 %v2791_v0 }
 0xc2c   :  { %1151 = vmatprep.subr.mxu0 %v2953_v7 }
 0xc2d   :  { %1152 = vmatpush1.msra.mxu0 %v2961_v8 }
 0xc2e   :  { %1153 = vmatprep.subr.mxu0 %v2971_v10 }
 0xc2f   :  { %1154 = vmatpush1.msra.mxu0 %v2977_v11 }
 0xc30   :  { %1155 = vmatprep.subr.mxu0 %v2984_v12 }
 0xc31   :  { %1156 = vmatpush1.msra.mxu0 %v2992_v13 }
 0xc32   :  { %1157 = vmatprep.subr.mxu0 %v3002_v15 }
 0xc33   :  { %1158 = vmatpush1.msra.mxu0 %v3008_v17 }
 0xc34   :  { %1159 = vmatprep.subr.mxu0 %v3015_v18 }
 0xc35   :  { %1160 = vmatpush1.msra.mxu0 %v3023_v19 }
 0xc36   :  { %1161 = vmatprep.subr.mxu0 %v3033_v21 }
 0xc37   :  { %1162 = vmatpush1.msra.mxu0 %v3039_v22 }
 0xc38   :  { %1163 = vmatprep.subr.mxu0 %v3046_v23 }
 0xc39   :  { %1164 = vmatpush1.msra.mxu0 %v3054_v24 }
 0xcea   :  { %v966_v54 = vpop.f32.mrf.mxu0 }
 0xceb   :  { %v973_v58 = vrot.slane %v966_v54, 4 }
 0xcec   :  { %v968_v55 = vpop.f32.mrf.mxu0 }
 0xced   :  { %v974_v50 = vrot.slane %v968_v55, 4  ;;  %v977_v34 = vadd.f32 %v973_v58, %v3103_v43 }
 0xcef   :  { %v978_v56 = vadd.f32 %v974_v50, %v3106_v45  ;;  %v2238_v59 = vmul.f32 -1.442695, %v977_v34 }
 0xcf1   :  { %2487 = vtanh.f32 %v978_v56  ;;  %v2239_v14 = vmul.f32 -1.442695, %v978_v56 }
 0xcf2   :  { %2489 = vpow2.f32 %v2238_v59 }
 0xcfe   :  { %v2488_v57 = vpop.eup %2487 }
 0xcff   :  { %997 = vrot.lane.b32.xlu0 %v2488_v57, %s2783_s25  ;;  %v2490_v60 = vpop.eup %2489 }
 0xd00   :  { %v985_v41 = vadd.f32 1.0, %v2490_v60 }
 0xd02   :  { %2491 = vrcp.f32 %v985_v41 }
 0xd0f   :  { %v2492_v61 = vpop.eup %2491 }
 0xd10   :  { %v995_v2 = vmul.f32 %v2492_v61, %v993_v39 }
 0xd71   :  { %v998_v63 = vpop.permute.xlu0 %997 }
 0xd72   :  { %v1000_v1 = vmul.f32 %v2492_v61, %v998_v63 }
 0xd74   :  { %1002 = vrot.lane.b32.xlu1 %v1000_v1, %s2783_s25 }
 0xde6   :  { %v1003_v45 = vpop.permute.xlu1 %1002 }
 0xde7   :  { %v1005_v3 = vadd.f32 %v1003_v45, %v995_v2 }
 0xde9   :  { %2493 = vtanh.f32 %v1005_v3 }
 0xdea   :  { %2495 = vpow2.f32 %v2239_v14 }
 0xdf6   :  { %v2494_v4 = vpop.eup %2493 }
 0xdf7   :  { %1008 = vrot.lane.b32.xlu0 %v2494_v4, %s2783_s25  ;;  %v2496_v43 = vpop.eup %2495 }
 0xdf8   :  { %v986_v16 = vadd.f32 1.0, %v2496_v43 }
 0xdfa   :  { %2497 = vrcp.f32 %v986_v16 }
 0xe07   :  { %v2498_v20 = vpop.eup %2497 }
 0xe69   :  { %v1009_v25 = vpop.permute.xlu0 %1008 }
 0xe6a   :  { %v3249_v26 = vmul.f32 %v2498_v20, %v1009_v25 }
 0xe6c   :  { %v1017_v28 = vrot.slane %v3249_v26, 4 }
 0xe6e   :  { %2240 = vmatmul.mubr.msk.f32.vlgmr.msra.gmra.mxu1 %vm310_vm2, %v1017_v28 }
 0xe6f   :  { %1276 = vmatpush1.msra.mxu1 %v2948_v6  ;;  %1323 = vmatprep.mubr.f32.mxu1 %v2791_v0  ;;  %v3271_v6 = vadd.f32 %v3110_v48, %v3096_v38 }
 0xe70   :  { %1277 = vmatprep.subr.mxu1 %v2953_v7 }
 0xe71   :  { %1278 = vmatpush1.msra.mxu1 %v2961_v8 }
 0xe72   :  { %1279 = vmatprep.subr.mxu1 %v2971_v10 }
 0xe73   :  { %1280 = vmatpush1.msra.mxu1 %v2977_v11 }
 0xe74   :  { %1281 = vmatprep.subr.mxu1 %v2984_v12 }
 0xe75   :  { %1282 = vmatpush1.msra.mxu1 %v2992_v13 }
 0xe76   :  { %1283 = vmatprep.subr.mxu1 %v3002_v15 }
 0xe77   :  { %1284 = vmatpush1.msra.mxu1 %v3008_v17 }
 0xe78   :  { %1285 = vmatprep.subr.mxu1 %v3015_v18 }
 0xe79   :  { %1286 = vmatpush1.msra.mxu1 %v3023_v19 }
 0xe7a   :  { %1287 = vmatprep.subr.mxu1 %v3033_v21  ;;  %v1107_v21 = vrot.slane %v1005_v3, 4 }
 0xe7b   :  { %1288 = vmatpush1.msra.mxu1 %v3039_v22 }
 0xe7c   :  { %1289 = vmatprep.subr.mxu1 %v3046_v23 }
 0xe7d   :  { %1290 = vmatpush1.msra.mxu1 %v3054_v24 }
 0xf2e   :  { %v1086_v0 = vpop.f32.mrf.mxu1 }
 0xf2f   :  { %v1091_v11 = vadd.f32 %v1086_v0, %v3108_v47 }
 0xf30   :  { %v1088_v7 = vpop.f32.mrf.mxu1 }
 0xf31   :  { %v1092_v8 = vadd.f32 %v1088_v7, %v3271_v6  ;;  %v2241_v12 = vmul.f32 -1.442695, %v1091_v11 }
 0xf33   :  { %2499 = vtanh.f32 %v1092_v8  ;;  %v2242_v48 = vmul.f32 -1.442695, %v1092_v8 }
 0xf34   :  { %2501 = vpow2.f32 %v2241_v12 }
 0xf40   :  { %v2500_v10 = vpop.eup %2499 }
 0xf41   :  { %1111 = vrot.lane.b32.xlu1 %v2500_v10, %s2783_s25  ;;  %v2502_v13 = vpop.eup %2501 }
 0xf42   :  { %v1099_v15 = vadd.f32 1.0, %v2502_v13  ;;  %v1386_v13 = vld [vmem:[%s3500_s6 + $0x8] sm:$0xff] }
 0xf44   :  { %2503 = vrcp.f32 %v1099_v15 }
 0xf51   :  { %v2504_v17 = vpop.eup %2503 }
 0xf52   :  { %v1109_v22 = vmul.f32 %v2504_v17, %v1107_v21 }
 0xfb3   :  { %v1112_v18 = vpop.permute.xlu1 %1111 }
 0xfb4   :  { %v1114_v19 = vmul.f32 %v2504_v17, %v1112_v18  ;;  %v1385_v18 = vld [vmem:[%s3500_s6] sm:$0xff] }
 0xfb6   :  { %1116 = vrot.lane.b32.xlu0 %v1114_v19, %s2783_s25 }
0x1028   :  { %v1117_v23 = vpop.permute.xlu0 %1116 }
0x1029   :  { %v1119_v24 = vadd.f32 %v1117_v23, %v1109_v22  ;;  %v1500_v23 = vld [vmem:[%s3502_s8 + $0x18] sm:$0xff] }
0x102b   :  { %2505 = vtanh.f32 %v1119_v24  ;;  %v1226_v50 = vrot.slane %v1119_v24, 4 }
0x102c   :  { %2507 = vpow2.f32 %v2242_v48 }
0x1038   :  { %v2506_v38 = vpop.eup %2505 }
0x1039   :  { %1122 = vrot.lane.b32.xlu1 %v2506_v38, %s2783_s25  ;;  %v2508_v29 = vpop.eup %2507 }
0x103a   :  { %v1100_v30 = vadd.f32 1.0, %v2508_v29 }
0x103c   :  { %2509 = vrcp.f32 %v1100_v30 }
0x1049   :  { %v2510_v31 = vpop.eup %2509 }
0x10ab   :  { %v1123_v32 = vpop.permute.xlu1 %1122 }
0x10ac   :  { %v3278_v27 = vmul.f32 %v2510_v31, %v1123_v32  ;;  %v1499_v32 = vld [vmem:[%s3502_s8 + $0x10] sm:$0xff] }
0x10ae   :  { %2243 = vmatmul.mubr.msk.f32.vlgmr.msra.gmra.mxu0 %vm310_vm2, %v3278_v27 }
0x116e   :  { %v1199_v33 = vpop.f32.mrf.mxu0 }
0x116f   :  { %v1206_v40 = vrot.slane %v1199_v33, 4 }
0x1170   :  { %v1201_v5 = vpop.f32.mrf.mxu0 }
0x1171   :  { %v1207_v35 = vrot.slane %v1201_v5, 4  ;;  %v1210_v44 = vadd.f32 %v1206_v40, %v3108_v47  ;;  %v1497_v5 = vld [vmem:[%s3502_s8] sm:$0xff] }
0x1173   :  { %v1211_v36 = vadd.f32 %v1207_v35, %v3271_v6  ;;  %v2244_v46 = vmul.f32 -1.442695, %v1210_v44  ;;  %v1715_v35 = vld [vmem:[#allocation14] sm:$0xff]  ;;  %v2543_v44 = vld [vmem:[%s3527_s23] sm:$0xff] }
0x1175   :  { %2511 = vtanh.f32 %v1211_v36  ;;  %v2245_v59 = vmul.f32 -1.442695, %v1211_v36  ;;  %v1593_v36 = vld [vmem:[#allocation12] sm:$0xff] }
0x1176   :  { %2513 = vpow2.f32 %v2244_v46  ;;  %2355 = vmatprep.subr.mxu1 %v1593_v36  ;;  %v2544_v46 = vld [vmem:[%s3527_s23 + $0x8] sm:$0xff] }
0x1182   :  { %v2512_v37 = vpop.eup %2511 }
0x1183   :  { %1230 = vrot.lane.b32.xlu0 %v2512_v37, %s2783_s25  ;;  %v2514_v49 = vpop.eup %2513 }
0x1184   :  { %v1218_v51 = vadd.f32 1.0, %v2514_v49  ;;  %v2545_v49 = vld [vmem:[%s3527_s23 + $0x10] sm:$0xff] }
0x1186   :  { %2515 = vrcp.f32 %v1218_v51  ;;  %v2546_v51 = vld [vmem:[%s3527_s23 + $0x18] sm:$0xff] }
0x1193   :  { %v2516_v52 = vpop.eup %2515 }
0x1194   :  { %v1228_v56 = vmul.f32 %v2516_v52, %v1226_v50 }
0x11f5   :  { %v1231_v54 = vpop.permute.xlu0 %1230 }
0x11f6   :  { %v1233_v55 = vmul.f32 %v2516_v52, %v1231_v54  ;;  %v1812_v52 = vld [vmem:[%s3506_s12 + $0x38] sm:$0xff]  ;;  %v2249_v54 = vld [vmem:[#allocation11] ss:$0 sm:$0xff] }
0x11f8   :  { %1235 = vrot.lane.b32.xlu1 %v1233_v55, %s2783_s25 }
0x126a   :  { %v1236_v57 = vpop.permute.xlu1 %1235 }
0x126b   :  { %v3286_v58 = vadd.f32 %v1236_v57, %v1228_v56 }
0x126d   :  { %2517 = vtanh.f32 %v3286_v58 }
0x126e   :  { %2519 = vpow2.f32 %v2245_v59 }
0x127a   :  { %v2518_v34 = vpop.eup %2517 }
0x127b   :  { %1241 = vrot.lane.b32.xlu0 %v2518_v34, %s2783_s25  ;;  %v2520_v60 = vpop.eup %2519 }
0x127c   :  { %v1219_v41 = vadd.f32 1.0, %v2520_v60  ;;  %v1811_v60 = vld [vmem:[%s3506_s12 + $0x30] sm:$0xff] }
0x127e   :  { %2521 = vrcp.f32 %v1219_v41  ;;  %v1810_v41 = vld [vmem:[%s3506_s12 + $0x28] sm:$0xff] }
0x128b   :  { %v2522_v61 = vpop.eup %2521 }
0x12ed   :  { %v1242_v63 = vpop.permute.xlu0 %1241 }
0x12ee   :  { %v1244_v1 = vmul.f32 %v2522_v61, %v1242_v63  ;;  %v1809_v61 = vld [vmem:[%s3506_s12 + $0x20] sm:$0xff]  ;;  %v1808_v63 = vld [vmem:[%s3506_s12 + $0x18] sm:$0xff] }
0x12f0   :  { %v1256_v39 = vrot.slane %v1244_v1, 4  ;;  %1250 = vst.msk [vmem:[#allocation18 - $0x4] sm:$0xf0] %vm548_vm3, %v1244_v1 }
0x12f2   :  { %2246 = vmatmul.mubr.msk.f32.vlgmr.msra.gmra.mxu1 %vm310_vm2, %v1256_v39  ;;  %v1806_v39 = vld [vmem:[%s3506_s12 + $0x8] sm:$0xff] }
0x12f3   :  { %2356 = vmatpush3.msra.mxu1 %v1593_v36 }
0x12f4   :  { %2371 = vmatprep.subr.mxu1 %v1812_v52 }
0x13b2   :  { %v1325_v2 = vpop.f32.mrf.mxu1 }
0x13b3   :  { %v1332_v43 = vrot.slane %v1325_v2, 4  ;;  %v1805_v2 = vld [vmem:[%s3506_s12] sm:$0xff] }
0x13b4   :  { %v1327_v45 = vpop.f32.mrf.mxu1 }
0x13b5   :  { %v1333_v3 = vrot.slane %v1327_v45, 4  ;;  %v1336_v16 = vadd.f32 %v1332_v43, %v3108_v47 }
0x13b7   :  { %v1337_v4 = vadd.f32 %v1333_v3, %v3271_v6  ;;  %v2247_v20 = vmul.f32 -1.442695, %v1336_v16 }
0x13b9   :  { %2523 = vtanh.f32 %v1337_v4  ;;  %v2248_v19 = vmul.f32 -1.442695, %v1337_v4 }
0x13ba   :  { %2525 = vpow2.f32 %v2247_v20 }
0x13c6   :  { %v2524_v14 = vpop.eup %2523 }
0x13c7   :  { %1353 = vrot.lane.b32.xlu1 %v2524_v14, %s2783_s25  ;;  %v2526_v25 = vpop.eup %2525  ;;  %v2254_v14 = vld [vmem:[%s3503_s9] ss:$0 sm:$0xff] }
0x13c8   :  { %v1344_v28 = vadd.f32 1.0, %v2526_v25 }
0x13ca   :  { %2527 = vrcp.f32 %v1344_v28 }
0x13d7   :  { %v2528_v0 = vpop.eup %2527 }
0x13d8   :  { %v1351_v47 = vmul.f32 %v2528_v0, %v3286_v58 }
0x1439   :  { %v1354_v7 = vpop.permute.xlu1 %1353 }
0x143a   :  { %v1356_v8 = vmul.f32 %v2528_v0, %v1354_v7 }
0x143c   :  { %1358 = vrot.lane.b32.xlu0 %v1356_v8, %s2783_s25 }
0x1440   :  { %545 = vrot.lane.b32.xlu0 %v3146_v62, %s2793_s5  ;;  %v1388_v62 = vld [vmem:[%s3500_s6 + $0x18] sm:$0xff] }
0x1441   :  { %2327 = vmatprep.subr.mxu0 %v1388_v62 }
0x1442   :  { %2328 = vmatpush3.msra.mxu0 %v1388_v62 }
0x1444   :  { %780 = vrot.lane.b32.xlu0 %v3198_v9, %s2793_s5 }
0x1448   :  { %1013 = vrot.lane.b32.xlu0 %v3249_v26, %s2793_s5  ;;  %v1387_v26 = vld [vmem:[%s3500_s6 + $0x10] sm:$0xff] }
0x1449   :  { %2329 = vmatprep.subr.mxu0 %v1387_v26 }
0x144a   :  { %2330 = vmatpush3.msra.mxu0 %v1387_v26 }
0x144b   :  { %2331 = vmatprep.subr.mxu0 %v1386_v13 }
0x144c   :  { %1246 = vrot.lane.b32.xlu0 %v1244_v1, %s2793_s5  ;;  %2332 = vmatpush3.msra.mxu0 %v1386_v13  ;;  %v1807_v1 = vld [vmem:[%s3506_s12 + $0x10] sm:$0xff] }
0x144d   :  { %2333 = vmatprep.subr.mxu0 %v1385_v18 }
0x144e   :  { %2334 = vmatpush3.msra.mxu0 %v1385_v18 }
0x144f   :  { %2341 = vmatprep.subr.mxu0 %v1500_v23 }
0x14ae   :  { %v1359_v6 = vpop.permute.xlu0 %1358 }
0x14af   :  { %v3304_v10 = vadd.f32 %v1359_v6, %v1351_v47 }
0x14b1   :  { %2529 = vtanh.f32 %v3304_v10 }
0x14b2   :  { %v546_v11 = vpop.permute.xlu0 %545  ;;  %2531 = vpow2.f32 %v2248_v19 }
0x14b3   :  { %549 = vst.msk [vmem:[#allocation2 - $0x4] sm:$0xf0] %vm548_vm3, %v546_v11 }
0x14b6   :  { %v781_v12 = vpop.permute.xlu0 %780 }
0x14b7   :  { %783 = vst.msk [vmem:[#allocation2 + $0x4] sm:$0xf0] %vm548_vm3, %v781_v12 }
0x14ba   :  { %v1014_v9 = vpop.permute.xlu0 %1013 }
0x14bb   :  { %1016 = vst.msk [vmem:[#allocation2 + $0xc] sm:$0xf0] %vm548_vm3, %v1014_v9 }
0x14be   :  { %v2530_v15 = vpop.eup %2529  ;;  %v1247_v17 = vpop.permute.xlu0 %1246 }
0x14bf   :  { %1249 = vst.msk [vmem:[#allocation2 + $0x14] sm:$0xf0] %vm548_vm3, %v1247_v17  ;;  %1364 = vrot.lane.b32.xlu1 %v2530_v15, %s2783_s25  ;;  %v2532_v21 = vpop.eup %2531 }
0x14c0   :  { %v1345_v22 = vadd.f32 1.0, %v2532_v21 }
0x14c2   :  { %2533 = vrcp.f32 %v1345_v22 }
0x14c3   :  { %660 = vrot.lane.b32.xlu1 %v3172_v42, %s2793_s5 }
0x14c7   :  { %894 = vrot.lane.b32.xlu1 %v3224_v53, %s2793_s5 }
0x14cb   :  { %1127 = vrot.lane.b32.xlu1 %v3278_v27, %s2793_s5  ;;  %v1498_v27 = vld [vmem:[%s3502_s8 + $0x8] sm:$0xff] }
0x14cf   :  { %v2534_v24 = vpop.eup %2533 }
0x1531   :  { %v1365_v38 = vpop.permute.xlu1 %1364 }
0x1532   :  { %v1367_v48 = vmul.f32 %v2534_v24, %v1365_v38 }
0x1534   :  { %1369 = vrot.lane.b32.xlu1 %v1367_v48, %s2793_s5 }
0x1535   :  { %v661_v42 = vpop.permute.xlu1 %660 }
0x1536   :  { %664 = vst.msk [vmem:[#allocation2 + $0x4] sm:$0xf] %vm663_vm4, %v661_v42 }
0x1539   :  { %v895_v53 = vpop.permute.xlu1 %894 }
0x153a   :  { %897 = vst.msk [vmem:[#allocation2 + $0xc] sm:$0xf] %vm663_vm4, %v895_v53 }
0x153d   :  { %v1128_v29 = vpop.permute.xlu1 %1127  ;;  %v1381_v30 = vld [vmem:[#allocation2] sm:$0xff] }
0x153e   :  { %1130 = vst.msk [vmem:[#allocation2 + $0x14] sm:$0xf] %vm663_vm4, %v1128_v29  ;;  %2335 = vmatprep.mubr.msk.f32.mxu0 %vm300_vm1, %v1381_v30 }
0x1541   :  { %v1382_v31 = vld [vmem:[#allocation2 + $0x8] sm:$0xff] }
0x1542   :  { %2336 = vmatmul.mubr.msk.f32.vlgmr.msra.gmra.mxu0 %vm300_vm1, %v1382_v31 }
0x1543   :  { %2342 = vmatpush3.msra.mxu0 %v1500_v23 }
0x1544   :  { %2343 = vmatprep.subr.mxu0 %v1499_v32 }
0x1545   :  { %v1383_v33 = vld [vmem:[#allocation2 + $0x10] sm:$0xff]  ;;  %2344 = vmatpush3.msra.mxu0 %v1499_v32 }
0x1546   :  { %2338 = vmatprep.mubr.msk.f32.mxu0 %vm300_vm1, %v1383_v33  ;;  %2345 = vmatprep.subr.mxu0 %v1498_v27  ;;  %v1910_v32 = vld [vmem:[#allocation15] sm:$0xf] }
0x1547   :  { %2346 = vmatpush3.msra.mxu0 %v1498_v27 }
0x1548   :  { %2347 = vmatprep.subr.mxu0 %v1497_v5 }
0x1549   :  { %2348 = vmatpush3.msra.mxu0 %v1497_v5 }
0x154a   :  { %2363 = vmatprep.subr.mxu0 %v1715_v35 }
0x15a6   :  { %v1370_v37 = vpop.permute.xlu1 %1369 }
0x15a7   :  { %1372 = vst.msk [vmem:[#allocation2 + $0x18] sm:$0xf0] %vm548_vm3, %v1370_v37  ;;  %1374 = vst.msk [vmem:[#allocation18] sm:$0xf0] %vm548_vm3, %v1370_v37 }
0x15ae   :  { %v1384_v40 = vld [vmem:[#allocation2 + $0x18] sm:$0xff] }
0x15af   :  { %2339 = vmatmul.mubr.msk.f32.gmra.mxu0 %vm300_vm1, %v1384_v40 }
0x15b0   :  { %2349 = vmatprep.mubr.msk.f32.mxu0 %vm300_vm1, %v1381_v30 }
0x15b3   :  { %2350 = vmatmul.mubr.msk.f32.vlgmr.msra.gmra.mxu0 %vm300_vm1, %v1382_v31 }
0x15b4   :  { %2352 = vmatprep.mubr.msk.f32.mxu0 %vm300_vm1, %v1383_v33  ;;  %2364 = vmatpush3.msra.mxu0 %v1715_v35 }
0x15b7   :  { %2353 = vmatmul.mubr.msk.f32.gmra.mxu0 %vm300_vm1, %v1384_v40 }
0x15b8   :  { %2365 = vmatprep.mubr.msk.f32.mxu0 %vm191_vm0, %v2543_v44 }
0x15bb   :  { %2366 = vmatmul.mubr.msk.f32.vlgmr.msra.gmra.mxu0 %vm191_vm0, %v2544_v46 }
0x15bc   :  { %2368 = vmatprep.mubr.msk.f32.mxu0 %vm191_vm0, %v2545_v49 }
0x15bf   :  { %2369 = vmatmul.mubr.msk.f32.gmra.mxu0 %vm191_vm0, %v2546_v51 }
0x1602   :  { %v2337_v55 = vpop.f32.mrf.mxu0 }
0x1603   :  { %v1480_v50 = vadd.f32 %v2337_v55, %v2249_v54 }
0x1604   :  { %v1474_v56 = vpop.f32.mrf.mxu0 }
0x1605   :  { %v1475_v57 = vadd.f32 %v2249_v54, %v1474_v56 }
0x1607   :  { %2535 = vtanh.f32 %v1475_v57 }
0x1608   :  { %2537 = vtanh.f32 %v1480_v50 }
0x1614   :  { %v3372_v34 = vpop.eup %2535 }
0x1615   :  { %v3374_v59 = vpop.eup %2537  ;;  %2357 = vmatprep.mubr.msk.f32.mxu1 %vm191_vm0, %v3372_v34  ;;  %v1911_v5 = vmul.f32 %v3372_v34, %v1910_v32 }
0x1616   :  { %2358 = vmatmul.mubr.msk.f32.vlgmr.msra.gmra.mxu1 %vm191_vm0, %v3374_v59 }
0x1617   :  { %2372 = vmatpush3.msra.mxu1 %v1812_v52 }
0x1618   :  { %2373 = vmatprep.subr.mxu1 %v1811_v60 }
0x1619   :  { %2374 = vmatpush3.msra.mxu1 %v1811_v60 }
0x161a   :  { %2375 = vmatprep.subr.mxu1 %v1810_v41 }
0x161b   :  { %2376 = vmatpush3.msra.mxu1 %v1810_v41 }
0x161c   :  { %2377 = vmatprep.subr.mxu1 %v1809_v61 }
0x161d   :  { %2378 = vmatpush3.msra.mxu1 %v1809_v61 }
0x161e   :  { %2379 = vmatprep.subr.mxu1 %v1808_v63 }
0x161f   :  { %2380 = vmatpush3.msra.mxu1 %v1808_v63 }
0x1620   :  { %2381 = vmatprep.subr.mxu1 %v1807_v1 }
0x1621   :  { %2382 = vmatpush3.msra.mxu1 %v1807_v1 }
0x1622   :  { %2383 = vmatprep.subr.mxu1 %v1806_v39 }
0x1623   :  { %2384 = vmatpush3.msra.mxu1 %v1806_v39 }
0x1624   :  { %2385 = vmatprep.subr.mxu1 %v1805_v2 }
0x1625   :  { %2386 = vmatpush3.msra.mxu1 %v1805_v2 }
0x166f   :  { %v2340_v45 = vpop.f32.mrf.mxu0 }
0x1670   :  { %v1490_v3 = vadd.f32 %v2340_v45, %v2249_v54 }
0x1671   :  { %v1484_v4 = vpop.f32.mrf.mxu0 }
0x1672   :  { %v1485_v43 = vadd.f32 %v2249_v54, %v1484_v4 }
0x1673   :  { %v2351_v16 = vpop.f32.mrf.mxu0 }
0x1674   :  { %2539 = vtanh.f32 %v1485_v43  ;;  %v1580_v20 = vadd.f32 %v2351_v16, %v2254_v14 }
0x1675   :  { %2541 = vtanh.f32 %v1490_v3  ;;  %v1574_v25 = vpop.f32.mrf.mxu0 }
0x1676   :  { %v1575_v28 = vadd.f32 %v2254_v14, %v1574_v25  ;;  %1697 = vrot.lane.b32.xlu1 %v1580_v20, %s2783_s25 }
0x1677   :  { %v2354_v0 = vpop.f32.mrf.mxu0 }
0x1678   :  { %v1590_v7 = vadd.f32 %v2354_v0, %v2254_v14  ;;  %1695 = vrot.lane.b32.xlu0 %v1575_v28, %s2783_s25 }
0x1679   :  { %v1584_v8 = vpop.f32.mrf.mxu0 }
0x167a   :  { %v1585_v47 = vadd.f32 %v2254_v14, %v1584_v8  ;;  %1701 = vrot.lane.b32.xlu1 %v1590_v7, %s2783_s25 }
0x167b   :  { %v2367_v6 = vpop.f32.mrf.mxu0 }
0x167c   :  { %1699 = vrot.lane.b32.xlu0 %v1585_v47, %s2783_s25  ;;  %v1802_v15 = vmul.f32 %v2367_v6, %v1580_v20  ;;  %v2055_v20 = vld [vmem:[%s3508_s14] sm:$0xff] }
0x167d   :  { %v1782_v11 = vpop.f32.mrf.mxu0 }
0x167e   :  { %1376 = vrot.lane.b32.xlu1 %v3304_v10, %s2792_s11  ;;  %v1801_v26 = vmul.f32 %v1782_v11, %v1575_v28 }
0x167f   :  { %v2370_v12 = vpop.f32.mrf.mxu0 }
0x1680   :  { %1252 = vrot.lane.b32.xlu0 %v3286_v58, %s2783_s25  ;;  %v1804_v10 = vmul.f32 %v2370_v12, %v1590_v7  ;;  %v1953_v58 = vld [vmem:[%s3507_s13] sm:$0xff] }
0x1681   :  { %v2540_v62 = vpop.eup %2539  ;;  %v1792_v13 = vpop.f32.mrf.mxu0  ;;  %2393 = vmatprep.subr.mxu0 %v1953_v58 }
0x1682   :  { %v3412_v9 = vpop.eup %2541  ;;  %2360 = vmatprep.mubr.msk.f32.mxu1 %vm191_vm0, %v2540_v62  ;;  %v1803_v17 = vmul.f32 %v1792_v13, %v1585_v47  ;;  %2394 = vmatpush3.msra.mxu0 %v1953_v58 }
0x1683   :  { %2361 = vmatmul.mubr.msk.f32.gmra.mxu1 %vm191_vm0, %v3412_v9  ;;  %2401 = vmatprep.subr.mxu0 %v2055_v20 }
0x1684   :  { %2387 = vmatprep.mubr.msk.f32.mxu1 %vm310_vm2, %v1801_v26 }
0x1687   :  { %2388 = vmatmul.mubr.msk.f32.vlgmr.msra.gmra.mxu1 %vm310_vm2, %v1802_v15 }
0x1688   :  { %2390 = vmatprep.mubr.msk.f32.mxu1 %vm310_vm2, %v1803_v17 }
0x168b   :  { %2391 = vmatmul.mubr.msk.f32.gmra.mxu1 %vm310_vm2, %v1804_v10 }
0x16d6   :  { %v2359_v18 = vpop.f32.mrf.mxu1 }
0x16d8   :  { %v1672_v22 = vpop.f32.mrf.mxu1 }
0x16e8   :  { %v1698_v19 = vpop.permute.xlu1 %1697 }
0x16e9   :  { %v1708_v21 = vsel %vm310_vm2, %v2359_v18, %v1698_v19 }
0x16ea   :  { %1712 = vst [vmem:[#allocation17 + $0x8] sm:$0xff] %v1708_v21  ;;  %v1696_v23 = vpop.permute.xlu0 %1695 }
0x16eb   :  { %v1707_v24 = vsel %vm310_vm2, %v1672_v22, %v1696_v23 }
0x16ec   :  { %1711 = vst [vmem:[#allocation17] sm:$0xff] %v1707_v24  ;;  %v1702_v38 = vpop.permute.xlu1 %1701 }
0x16ee   :  { %v1700_v48 = vpop.permute.xlu0 %1699 }
0x16f0   :  { %v1377_v42 = vpop.permute.xlu1 %1376 }
0x16f1   :  { %1380 = vst.msk [vmem:[#allocation20] sm:$0xf0] %vm548_vm3, %v1377_v42 }
0x16f2   :  { %v1253_v53 = vpop.permute.xlu0 %1252 }
0x16f3   :  { %1255 = vst.msk [vmem:[#allocation20 - $0x4] sm:$0xf0] %vm548_vm3, %v1253_v53 }
0x1743   :  { %v2362_v29 = vpop.f32.mrf.mxu1 }
0x1744   :  { %v1710_v30 = vsel %vm310_vm2, %v2362_v29, %v1702_v38 }
0x1745   :  { %1714 = vst [vmem:[#allocation17 + $0x18] sm:$0xff] %v1710_v30  ;;  %v1682_v31 = vpop.f32.mrf.mxu1 }
0x1746   :  { %v1709_v27 = vsel %vm310_vm2, %v1682_v31, %v1700_v48 }
0x1747   :  { %1713 = vst [vmem:[#allocation17 + $0x10] sm:$0xff] %v1709_v27  ;;  %v2389_v33 = vpop.f32.mrf.mxu1 }
0x1749   :  { %v1891_v35 = vpop.f32.mrf.mxu1 }
0x174a   :  { %v1912_v36 = vadd.f32 %v1911_v5, %v1891_v35 }
0x174b   :  { %v2392_v56 = vpop.f32.mrf.mxu1 }
0x174c   :  { %v1914_v37 = vrot.slane %v1912_v36, 4 }
0x174d   :  { %v1901_v41 = vpop.f32.mrf.mxu1 }
0x174e   :  { %v1916_v40 = vmul.f32 %v3372_v34, %v1914_v37 }
0x1750   :  { %v1917_v44 = vadd.f32 %v1916_v40, %v1891_v35 }
0x1752   :  { %v1919_v46 = vrot.slane %v1917_v44, 4  ;;  %v1949_v49 = vsel %vm1948_vm5, %v1912_v36, %v1917_v44 }
0x1753   :  { %2395 = vmatprep.mubr.msk.f32.mxu0 %vm191_vm0, %v1949_v49 }
0x1754   :  { %v1921_v51 = vmul.f32 %v3374_v59, %v1919_v46 }
0x1756   :  { %v1922_v52 = vadd.f32 %v2389_v33, %v1921_v51 }
0x1758   :  { %v1924_v54 = vrot.slane %v1922_v52, 4 }
0x175a   :  { %v1926_v55 = vmul.f32 %v3374_v59, %v1924_v54 }
0x175c   :  { %v1927_v50 = vadd.f32 %v2389_v33, %v1926_v55 }
0x175e   :  { %v1929_v57 = vrot.slane %v1927_v50, 4  ;;  %v1950_v60 = vsel %vm1948_vm5, %v1922_v52, %v1927_v50 }
0x175f   :  { %2396 = vmatmul.mubr.msk.f32.vlgmr.msra.gmra.mxu0 %vm191_vm0, %v1950_v60 }
0x1760   :  { %v1931_v34 = vmul.f32 %v2540_v62, %v1929_v57  ;;  %2402 = vmatpush3.msra.mxu0 %v2055_v20 }
0x1762   :  { %v1932_v61 = vadd.f32 %v1931_v34, %v1901_v41 }
0x1764   :  { %v1934_v63 = vrot.slane %v1932_v61, 4 }
0x1766   :  { %v1936_v1 = vmul.f32 %v2540_v62, %v1934_v63 }
0x1768   :  { %v1937_v39 = vadd.f32 %v1936_v1, %v1901_v41 }
0x176a   :  { %v1939_v2 = vrot.slane %v1937_v39, 4  ;;  %v1951_v45 = vsel %vm1948_vm5, %v1932_v61, %v1937_v39 }
0x176b   :  { %2398 = vmatprep.mubr.msk.f32.mxu0 %vm191_vm0, %v1951_v45 }
0x176c   :  { %v1941_v59 = vmul.f32 %v3412_v9, %v1939_v2 }
0x176e   :  { %v1942_v3 = vadd.f32 %v2392_v56, %v1941_v59 }
0x1770   :  { %v1944_v4 = vrot.slane %v1942_v3, 4 }
0x1772   :  { %v1946_v14 = vmul.f32 %v3412_v9, %v1944_v4 }
0x1774   :  { %v1947_v43 = vadd.f32 %v2392_v56, %v1946_v14 }
0x1776   :  { %v1952_v16 = vsel %vm1948_vm5, %v1942_v3, %v1947_v43 }
0x1777   :  { %2399 = vmatmul.mubr.msk.f32.gmra.mxu0 %vm191_vm0, %v1952_v16 }
0x181f   :  { %v2397_v25 = vpop.f32.mrf.mxu0 }
0x1820   :  { %2052 = vst.msk [vmem:[%s3511_s17 + $0x8] sm:$0xff] %vm191_vm0, %v2397_v25 }
0x1821   :  { %v2032_v28 = vpop.f32.mrf.mxu0 }
0x1822   :  { %2051 = vst.msk [vmem:[%s3511_s17] sm:$0xff] %vm191_vm0, %v2032_v28  ;;  %2403 = vmatprep.mubr.msk.f32.mxu0 %vm191_vm0, %v2032_v28 }
0x1823   :  { %2404 = vmatmul.mubr.msk.f32.vlgmr.msra.gmra.mxu0 %vm191_vm0, %v2397_v25 }
0x1837   :  { %v2400_v0 = vpop.f32.mrf.mxu0 }
0x1838   :  { %2054 = vst.msk [vmem:[%s3511_s17 + $0x18] sm:$0xff] %vm191_vm0, %v2400_v0 }
0x1839   :  { %v2042_v7 = vpop.f32.mrf.mxu0 }
0x183a   :  { %2053 = vst.msk [vmem:[%s3511_s17 + $0x10] sm:$0xff] %vm191_vm0, %v2042_v7  ;;  %2406 = vmatprep.mubr.msk.f32.mxu0 %vm191_vm0, %v2042_v7 }
0x183b   :  { %2407 = vmatmul.mubr.msk.f32.gmra.mxu0 %vm191_vm0, %v2400_v0 }
0x183c   :  { %2718 = shalt.err (!%p2715_p2)
}
0x183d   :  { %2185 = dma.vmem_to_hbm [thread:$0]  %s2180_s1, 128, %s3513_s19, [#allocation19], %s2783_s25, %s2783_s25, %s2784_s3  }
0x183e   :  { %s2727_s24 = scalar_lea.vmem %s2168_s2, 512  ;;  %p2732_p4 = scmp.lt.s32.totalorder %s2168_s2, %s2168_s2 }
0x183f   :  { %p2728_p3 = scmp.ne.s32.totalorder %s2168_s2, %s2727_s24  ;;  %p2733_p5 = scmp.lt.s32.totalorder %s2727_s24, %s2727_s24 }
0x1841   :  { %p2734_p6 = por %p2733_p5, %p2732_p4 }
0x1843   :  { %p2735_p7 = pnand %p2734_p6, %p2728_p3 }
0x1845   :  { %2738 = shalt.err (!%p2735_p7)
}
0x1846   :  { %s2796_s8 = smov 128   ;;  %s2797_s28 = smov 8  }
0x1847   :  { %2173 = dma.vmem_to_hbm [thread:$0]  %s2168_s2, 512, %s3512_s18, [#allocation5], %s2796_s8, %s2796_s8, %s2797_s28  }
0x1848   :  { %s2798_s4 = smov [#allocation20]  }
0x1849   :  { %s2191_s30 = sshll.u32 %s2798_s4, 4  ;;  %s2192_s30 = int_to_ptr.vmem [resolvable:$true] %s2191_s30 }
0x184a   :  { %s2747_s9 = scalar_lea.vmem %s2192_s30, 128  ;;  %p2752_p9 = scmp.lt.s32.totalorder %s2192_s30, %s2192_s30 }
0x184b   :  { %p2748_p8 = scmp.ne.s32.totalorder %s2192_s30, %s2747_s9  ;;  %p2753_p10 = scmp.lt.s32.totalorder %s2747_s9, %s2747_s9 }
0x184d   :  { %p2754_p11 = por %p2753_p10, %p2752_p9 }
0x184f   :  { %p2755_p12 = pnand %p2754_p11, %p2748_p8 }
0x1851   :  { %2758 = shalt.err (!%p2755_p12)
}
0x1852   :  { %2197 = dma.vmem_to_hbm [thread:$0]  %s2192_s30, 128, %s3514_s20, [#allocation19], %s2783_s25, %s2783_s25, %s2784_s3   ;;  %vm2153_vm6 = vcmask 31744  }
0x1853   :  { %s3528_s11 = sld [smem:[#allocation33_spill]] }
0x18e3   :  { %v2405_v8 = vpop.f32.mrf.mxu0 }
0x18e4   :  { %2155 = vst.msk [vmem:[%s3528_s11 + $0x8] sm:$0xff] %vm2153_vm6, %v2405_v8 }
0x18e5   :  { %v2134_v47 = vpop.f32.mrf.mxu0 }
0x18e6   :  { %2154 = vst.msk [vmem:[%s3528_s11] sm:$0xff] %vm2153_vm6, %v2134_v47 }
0x18fb   :  { %v2408_v6 = vpop.f32.mrf.mxu0 }
0x18fc   :  { %2157 = vst.msk [vmem:[%s3528_s11 + $0x18] sm:$0xff] %vm2153_vm6, %v2408_v6 }
0x18fd   :  { %v2144_v11 = vpop.f32.mrf.mxu0 }
0x18fe   :  { %2156 = vst.msk [vmem:[%s3528_s11 + $0x10] sm:$0xff] %vm2153_vm6, %v2144_v11 }
0x18ff   :  { %2777 = dma.done.wait [#allocation5], 512  }
0x1900   :  { %2778 = vsyncadd [#allocation5], 4294966784 }
0x1901   :  { %2779 = dma.done.wait [#allocation19], 256  }
0x1902   :  { %2780 = vsyncadd [#allocation19], 4294967040 }
0x1903   :  { %2211 = vsyncpa [#allocation4], 1 }
0x1904   :  { %2212 = vsyncpa [#allocation7], 1 }
0x1905   :  { %2213 = vsyncpa [#allocation10], 1 }
0x1906   :  { %2214 = vsyncpa [#allocation13], 1 }
0x1907   :  { %2215 = vsyncpa [#allocation16], 1 }
0x1908   :  { %2216 = vsyncpa [#allocation5], 1 }
0x1909   :  { %2217 = vsyncpa [#allocation19], 1 }

</bundles_post_ra>
